<compile_context>
chip_gen: v7x
topology: tpu7x:2x2x1
jax: 0.10.0
libtpu: 0.0.40
codegen_flags: <defaults>
</compile_context>

<pallas_src>
import jax
import jax.numpy as jnp
from jax.experimental import pallas as pl
from jax.experimental.pallas import tpu as pltpu


HP = 128    # lane-aligned padded hidden size per gate (H=50 -> 128)
BPAD = 8    # sublane-tile padded batch (B=2 -> 8) so per-step slabs are full (8, .) tiles


def pack_params(params):
    """One-time packing of PyTorch-layout LSTM/Linear weights into lane/sublane-aligned tensors.
    Gate order in the PyTorch packed tensors is i, f, g, o; padded lanes are exactly zero."""
    H = params["w_hh"].shape[1]      # w_hh: (4H, H)
    I = params["w_ih"].shape[1]      # w_ih: (4H, I)
    O = params["w_fc"].shape[0]      # w_fc: (O, H)
    assert H <= HP

    w_ih = params["w_ih"]
    w_hh = params["w_hh"]
    b_all = params["b_ih"] + params["b_hh"]

    wx = jnp.zeros((I, 4 * HP), jnp.float32)   # x-projection, gate-strided by HP lanes (VPU path)
    wh = jnp.zeros((HP, 4 * HP), jnp.float32)  # recurrent projection (MXU path, stored bf16)
    bp = jnp.zeros((1, 4 * HP), jnp.float32)
    for g in range(4):
        wx = wx.at[:, g * HP:g * HP + H].set(w_ih[g * H:(g + 1) * H, :].T)
        wh = wh.at[:H, g * HP:g * HP + H].set(w_hh[g * H:(g + 1) * H, :].T)
        bp = bp.at[0, g * HP:g * HP + H].set(b_all[g * H:(g + 1) * H])

    if O == 1:
        # Row form so the final FC is a VPU multiply + lane reduction (skip the N=1 MXU pass).
        wfc = jnp.zeros((1, HP), jnp.float32).at[0, :H].set(params["w_fc"][0, :])
    else:
        wfc = jnp.zeros((HP, O), jnp.float32).at[:H, :].set(params["w_fc"].T)
    bfc = params["b_fc"].reshape(1, O).astype(jnp.float32)

    return {
        "wx": wx,                            # f32: consumed on the VPU (K = I is tiny)
        "wh": wh.astype(jnp.bfloat16),       # bf16 MXU operand, streamed from VMEM each step
        "bp": bp,
        "wfc": wfc,
        "bfc": bfc,
    }


@jax.jit
def lstm_model_forward(x, packed):
    """x: (B, T, I) float32; packed = pack_params(params). Returns (B, O) float32,
    matching PyTorch LSTMModel.forward."""
    B, T, I = x.shape
    O = packed["bfc"].shape[1]
    G4 = 4 * HP
    assert B <= BPAD

    # (B, T, I) -> (T, BPAD, I) with zero rows for the padded batch, flattened so each timestep
    # of the hoisted gate projection is a full 8-row sublane tile.
    x_p = jnp.zeros((T, BPAD, I), jnp.float32)
    x_p = x_p.at[:, :B, :].set(jnp.transpose(x, (1, 0, 2)).astype(jnp.float32))
    x_tb = x_p.reshape(T * BPAD, I)

    def kernel(x_ref, wx_ref, wh_ref, b_ref, wfc_ref, bfc_ref, out_ref, xg_ref):
        # Hoisted, time-independent input projection + bias for ALL timesteps.
        # K = I (=3) is a degenerate MXU shape -> I VPU broadcast-FMAs instead of an MXU pass.
        xg = jnp.broadcast_to(b_ref[...], (T * BPAD, G4))
        for k in range(I):
            xg = xg + x_ref[:, k:k + 1] * wx_ref[k:k + 1, :]
        # Park in VMEM scratch as tile-aligned (BPAD, 4*HP) slabs so xg is not held live in
        # vregs across the serial recurrence.
        for t in range(T):
            xg_ref[t] = xg[t * BPAD:(t + 1) * BPAD, :]

        def step(t, carry):
            h, c = carry
            # Recurrent matmul: RHS streamed from VMEM every step (never register-resident);
            # bf16 operands, f32 accumulation on the MXU.
            z = xg_ref[t] + jnp.dot(h.astype(jnp.bfloat16), wh_ref[...],
                                    preferred_element_type=jnp.float32)
            if_g = jax.nn.sigmoid(z[:, 0:2 * HP])          # fused i|f EUP pass
            g_g = jnp.tanh(z[:, 2 * HP:3 * HP])
            o_g = jax.nn.sigmoid(z[:, 3 * HP:4 * HP])
            c = if_g[:, HP:2 * HP] * c + if_g[:, 0:HP] * g_g
            h = o_g * jnp.tanh(c)
            return h, c

        h0 = jnp.zeros((BPAD, HP), jnp.float32)
        c0 = jnp.zeros((BPAD, HP), jnp.float32)
        h, _ = jax.lax.fori_loop(0, T, step, (h0, c0), unroll=True)

        # Fused final FC on the last hidden state.
        if O == 1:
            # N = 1 is a degenerate MXU shape -> VPU multiply + lane reduction on the XLU.
            out_ref[...] = jnp.sum(h * wfc_ref[...], axis=-1, keepdims=True) + bfc_ref[...]
        else:
            out_ref[...] = (jnp.dot(h, wfc_ref[...], preferred_element_type=jnp.float32)
                            + bfc_ref[...])

    vmem = pl.BlockSpec(memory_space=pltpu.MemorySpace.VMEM)
    out_pad = pl.pallas_call(
        kernel,
        out_shape=jax.ShapeDtypeStruct((BPAD, O), jnp.float32),
        in_specs=[vmem] * 6,
        out_specs=vmem,
        scratch_shapes=[pltpu.VMEM((T, BPAD, G4), jnp.float32)],
    )(x_tb, packed["wx"], packed["wh"], packed["bp"], packed["wfc"], packed["bfc"])
    return out_pad[:B]


def init_params(key, input_size=3, hidden_size=50, output_size=1):
    """Deterministic init matching PyTorch nn.LSTM / nn.Linear shapes (uniform +/- 1/sqrt(fan))."""
    k_lstm = 1.0 / jnp.sqrt(jnp.float32(hidden_size))
    k_fc = 1.0 / jnp.sqrt(jnp.float32(hidden_size))
    keys = jax.random.split(key, 6)
    u = lambda k, shape, lim: jax.random.uniform(k, shape, jnp.float32, -lim, lim)
    return {
        "w_ih": u(keys[0], (4 * hidden_size, input_size), k_lstm),
        "w_hh": u(keys[1], (4 * hidden_size, hidden_size), k_lstm),
        "b_ih": u(keys[2], (4 * hidden_size,), k_lstm),
        "b_hh": u(keys[3], (4 * hidden_size,), k_lstm),
        "w_fc": u(keys[4], (output_size, hidden_size), k_fc),
        "b_fc": u(keys[5], (output_size,), k_fc),
    }


def reference_forward(x, params):
    """Pure-JAX f32 reference of the PyTorch module for sanity checking."""
    B, T, I = x.shape
    H = params["w_hh"].shape[1]
    w_ih, w_hh = params["w_ih"], params["w_hh"]
    b = params["b_ih"] + params["b_hh"]

    def step(carry, x_t):
        h, c = carry
        gates = x_t @ w_ih.T + h @ w_hh.T + b           # (B, 4H)
        i = jax.nn.sigmoid(gates[:, 0:H])
        f = jax.nn.sigmoid(gates[:, H:2 * H])
        g = jnp.tanh(gates[:, 2 * H:3 * H])
        o = jax.nn.sigmoid(gates[:, 3 * H:4 * H])
        c_new = f * c + i * g
        h_new = o * jnp.tanh(c_new)
        return (h_new, c_new), None

    h0 = jnp.zeros((B, H), jnp.float32)
    c0 = jnp.zeros((B, H), jnp.float32)
    (h_T, _), _ = jax.lax.scan(step, (h0, c0), jnp.swapaxes(x, 0, 1))
    return h_T @ params["w_fc"].T + params["b_fc"]


if __name__ == "__main__":
    key = jax.random.PRNGKey(0)
    k_x, k_p = jax.random.split(key)

    B, T, I = 2, 8, 3          # batch=2, seq=8, input_size=3 (module default)
    H, O = 50, 1               # hidden_size=50, output_size=1 (module defaults)

    x = jax.random.normal(k_x, (B, T, I), jnp.float32)
    params = init_params(k_p, input_size=I, hidden_size=H, output_size=O)
    packed = pack_params(params)     # one-time weight packing, off the per-call path

    out = lstm_model_forward(x, packed)
    out = jax.block_until_ready(out)

    ref = reference_forward(x, params)
    assert out.shape == (B, O)
    # bf16 MXU operands in the recurrence vs. the f32 reference -> slightly looser tolerance.
    assert jnp.allclose(out, ref, atol=2e-2, rtol=2e-2), (out, ref)

    print("KERNEL_OK")
</pallas_src>

<mosaic_0001>
module attributes {stable_mosaic.version = 11 : i64} {
  func.func @kernel(%arg0: memref<64x3xf32, #tpu.memory_space<vmem>>, %arg1: memref<3x512xf32, #tpu.memory_space<vmem>>, %arg2: memref<128x512xbf16, #tpu.memory_space<vmem>>, %arg3: memref<1x512xf32, #tpu.memory_space<vmem>>, %arg4: memref<1x128xf32, #tpu.memory_space<vmem>>, %arg5: memref<1x1xf32, #tpu.memory_space<vmem>>, %arg6: memref<8x1xf32, #tpu.memory_space<vmem>>, %arg7: memref<8x8x512xf32, #tpu.memory_space<vmem>>) attributes {dimension_semantics = [], scalar_prefetch = 0 : i64, scratch_operands = 1 : i64, tpu.core_type = #tpu.core_type<tc>} {
    %c0 = arith.constant 0 : index
    %c0_0 = arith.constant 0 : index
    %0 = vector.load %arg3[%c0, %c0_0] : memref<1x512xf32, #tpu.memory_space<vmem>>, vector<1x512xf32>
    %1 = vector.shape_cast %0 : vector<1x512xf32> to vector<1x512xf32>
    %2 = vector.broadcast %1 : vector<1x512xf32> to vector<64x512xf32>
    %c0_1 = arith.constant 0 : index
    %c0_2 = arith.constant 0 : index
    %3 = vector.load %arg0[%c0_1, %c0_2] : memref<64x3xf32, #tpu.memory_space<vmem>>, vector<64x1xf32>
    %c0_3 = arith.constant 0 : index
    %c0_4 = arith.constant 0 : index
    %4 = vector.load %arg1[%c0_3, %c0_4] : memref<3x512xf32, #tpu.memory_space<vmem>>, vector<1x512xf32>
    %5 = vector.broadcast %3 : vector<64x1xf32> to vector<64x512xf32>
    %6 = vector.broadcast %4 : vector<1x512xf32> to vector<64x512xf32>
    %7 = arith.mulf %5, %6 : vector<64x512xf32>
    %8 = arith.addf %2, %7 : vector<64x512xf32>
    %c0_5 = arith.constant 0 : index
    %c1 = arith.constant 1 : index
    %9 = vector.load %arg0[%c0_5, %c1] : memref<64x3xf32, #tpu.memory_space<vmem>>, vector<64x1xf32>
    %c1_6 = arith.constant 1 : index
    %c0_7 = arith.constant 0 : index
    %10 = vector.load %arg1[%c1_6, %c0_7] : memref<3x512xf32, #tpu.memory_space<vmem>>, vector<1x512xf32>
    %11 = vector.broadcast %9 : vector<64x1xf32> to vector<64x512xf32>
    %12 = vector.broadcast %10 : vector<1x512xf32> to vector<64x512xf32>
    %13 = arith.mulf %11, %12 : vector<64x512xf32>
    %14 = arith.addf %8, %13 : vector<64x512xf32>
    %c0_8 = arith.constant 0 : index
    %c2 = arith.constant 2 : index
    %15 = vector.load %arg0[%c0_8, %c2] : memref<64x3xf32, #tpu.memory_space<vmem>>, vector<64x1xf32>
    %c2_9 = arith.constant 2 : index
    %c0_10 = arith.constant 0 : index
    %16 = vector.load %arg1[%c2_9, %c0_10] : memref<3x512xf32, #tpu.memory_space<vmem>>, vector<1x512xf32>
    %17 = vector.broadcast %15 : vector<64x1xf32> to vector<64x512xf32>
    %18 = vector.broadcast %16 : vector<1x512xf32> to vector<64x512xf32>
    %19 = arith.mulf %17, %18 : vector<64x512xf32>
    %20 = arith.addf %14, %19 : vector<64x512xf32>
    %21 = vector.extract_strided_slice %20 {offsets = [0, 0], sizes = [8, 512], strides = [1, 1]} : vector<64x512xf32> to vector<8x512xf32>
    %c0_11 = arith.constant 0 : index
    %c0_12 = arith.constant 0 : index
    %c0_13 = arith.constant 0 : index
    %22 = vector.load %arg7[%c0_11, %c0_12, %c0_13] : memref<8x8x512xf32, #tpu.memory_space<vmem>>, vector<1x8x512xf32>
    %23 = vector.shape_cast %22 : vector<1x8x512xf32> to vector<8x512xf32>
    %24 = vector.shape_cast %21 : vector<8x512xf32> to vector<1x8x512xf32>
    tpu.vector_store %arg7[%c0_11, %c0_12, %c0_13], %24 {strides = array<i32>} : memref<8x8x512xf32, #tpu.memory_space<vmem>>, vector<1x8x512xf32>,
    %25 = vector.extract_strided_slice %20 {offsets = [8, 0], sizes = [8, 512], strides = [1, 1]} : vector<64x512xf32> to vector<8x512xf32>
    %c1_14 = arith.constant 1 : index
    %c0_15 = arith.constant 0 : index
    %c0_16 = arith.constant 0 : index
    %26 = vector.load %arg7[%c1_14, %c0_15, %c0_16] : memref<8x8x512xf32, #tpu.memory_space<vmem>>, vector<1x8x512xf32>
    %27 = vector.shape_cast %26 : vector<1x8x512xf32> to vector<8x512xf32>
    %28 = vector.shape_cast %25 : vector<8x512xf32> to vector<1x8x512xf32>
    tpu.vector_store %arg7[%c1_14, %c0_15, %c0_16], %28 {strides = array<i32>} : memref<8x8x512xf32, #tpu.memory_space<vmem>>, vector<1x8x512xf32>,
    %29 = vector.extract_strided_slice %20 {offsets = [16, 0], sizes = [8, 512], strides = [1, 1]} : vector<64x512xf32> to vector<8x512xf32>
    %c2_17 = arith.constant 2 : index
    %c0_18 = arith.constant 0 : index
    %c0_19 = arith.constant 0 : index
    %30 = vector.load %arg7[%c2_17, %c0_18, %c0_19] : memref<8x8x512xf32, #tpu.memory_space<vmem>>, vector<1x8x512xf32>
    %31 = vector.shape_cast %30 : vector<1x8x512xf32> to vector<8x512xf32>
    %32 = vector.shape_cast %29 : vector<8x512xf32> to vector<1x8x512xf32>
    tpu.vector_store %arg7[%c2_17, %c0_18, %c0_19], %32 {strides = array<i32>} : memref<8x8x512xf32, #tpu.memory_space<vmem>>, vector<1x8x512xf32>,
    %33 = vector.extract_strided_slice %20 {offsets = [24, 0], sizes = [8, 512], strides = [1, 1]} : vector<64x512xf32> to vector<8x512xf32>
    %c3 = arith.constant 3 : index
    %c0_20 = arith.constant 0 : index
    %c0_21 = arith.constant 0 : index
    %34 = vector.load %arg7[%c3, %c0_20, %c0_21] : memref<8x8x512xf32, #tpu.memory_space<vmem>>, vector<1x8x512xf32>
    %35 = vector.shape_cast %34 : vector<1x8x512xf32> to vector<8x512xf32>
    %36 = vector.shape_cast %33 : vector<8x512xf32> to vector<1x8x512xf32>
    tpu.vector_store %arg7[%c3, %c0_20, %c0_21], %36 {strides = array<i32>} : memref<8x8x512xf32, #tpu.memory_space<vmem>>, vector<1x8x512xf32>,
    %37 = vector.extract_strided_slice %20 {offsets = [32, 0], sizes = [8, 512], strides = [1, 1]} : vector<64x512xf32> to vector<8x512xf32>
    %c4 = arith.constant 4 : index
    %c0_22 = arith.constant 0 : index
    %c0_23 = arith.constant 0 : index
    %38 = vector.load %arg7[%c4, %c0_22, %c0_23] : memref<8x8x512xf32, #tpu.memory_space<vmem>>, vector<1x8x512xf32>
    %39 = vector.shape_cast %38 : vector<1x8x512xf32> to vector<8x512xf32>
    %40 = vector.shape_cast %37 : vector<8x512xf32> to vector<1x8x512xf32>
    tpu.vector_store %arg7[%c4, %c0_22, %c0_23], %40 {strides = array<i32>} : memref<8x8x512xf32, #tpu.memory_space<vmem>>, vector<1x8x512xf32>,
    %41 = vector.extract_strided_slice %20 {offsets = [40, 0], sizes = [8, 512], strides = [1, 1]} : vector<64x512xf32> to vector<8x512xf32>
    %c5 = arith.constant 5 : index
    %c0_24 = arith.constant 0 : index
    %c0_25 = arith.constant 0 : index
    %42 = vector.load %arg7[%c5, %c0_24, %c0_25] : memref<8x8x512xf32, #tpu.memory_space<vmem>>, vector<1x8x512xf32>
    %43 = vector.shape_cast %42 : vector<1x8x512xf32> to vector<8x512xf32>
    %44 = vector.shape_cast %41 : vector<8x512xf32> to vector<1x8x512xf32>
    tpu.vector_store %arg7[%c5, %c0_24, %c0_25], %44 {strides = array<i32>} : memref<8x8x512xf32, #tpu.memory_space<vmem>>, vector<1x8x512xf32>,
    %45 = vector.extract_strided_slice %20 {offsets = [48, 0], sizes = [8, 512], strides = [1, 1]} : vector<64x512xf32> to vector<8x512xf32>
    %c6 = arith.constant 6 : index
    %c0_26 = arith.constant 0 : index
    %c0_27 = arith.constant 0 : index
    %46 = vector.load %arg7[%c6, %c0_26, %c0_27] : memref<8x8x512xf32, #tpu.memory_space<vmem>>, vector<1x8x512xf32>
    %47 = vector.shape_cast %46 : vector<1x8x512xf32> to vector<8x512xf32>
    %48 = vector.shape_cast %45 : vector<8x512xf32> to vector<1x8x512xf32>
    tpu.vector_store %arg7[%c6, %c0_26, %c0_27], %48 {strides = array<i32>} : memref<8x8x512xf32, #tpu.memory_space<vmem>>, vector<1x8x512xf32>,
    %49 = vector.extract_strided_slice %20 {offsets = [56, 0], sizes = [8, 512], strides = [1, 1]} : vector<64x512xf32> to vector<8x512xf32>
    %c7 = arith.constant 7 : index
    %c0_28 = arith.constant 0 : index
    %c0_29 = arith.constant 0 : index
    %50 = vector.load %arg7[%c7, %c0_28, %c0_29] : memref<8x8x512xf32, #tpu.memory_space<vmem>>, vector<1x8x512xf32>
    %51 = vector.shape_cast %50 : vector<1x8x512xf32> to vector<8x512xf32>
    %52 = vector.shape_cast %49 : vector<8x512xf32> to vector<1x8x512xf32>
    tpu.vector_store %arg7[%c7, %c0_28, %c0_29], %52 {strides = array<i32>} : memref<8x8x512xf32, #tpu.memory_space<vmem>>, vector<1x8x512xf32>,
    %cst = arith.constant 0.000000e+00 : f32
    %53 = vector.broadcast %cst : f32 to vector<8x128xf32>
    %cst_30 = arith.constant 0.000000e+00 : f32
    %54 = vector.broadcast %cst_30 : f32 to vector<8x128xf32>
    %c0_i32 = arith.constant 0 : i32
    %55 = arith.index_cast %c0_i32 : i32 to index
    %c0_31 = arith.constant 0 : index
    %c0_32 = arith.constant 0 : index
    %56 = vector.load %arg7[%55, %c0_31, %c0_32] : memref<8x8x512xf32, #tpu.memory_space<vmem>>, vector<1x8x512xf32>
    %57 = vector.shape_cast %56 : vector<1x8x512xf32> to vector<8x512xf32>
    %58 = arith.truncf %53 : vector<8x128xf32> to vector<8x128xbf16>
    %c0_33 = arith.constant 0 : index
    %c0_34 = arith.constant 0 : index
    %59 = vector.load %arg2[%c0_33, %c0_34] : memref<128x512xbf16, #tpu.memory_space<vmem>>, vector<128x512xbf16>
    %cst_35 = arith.constant dense<0.000000e+00> : vector<8x512xf32>
    %60 = tpu.matmul %58, %59, %cst_35 {dimension_numbers = #tpu.dot_dimension_numbers<[1], [0], [0], [1], [0, 0, 1, 1], [], []>} : vector<8x128xbf16>, vector<128x512xbf16>, vector<8x512xf32> -> vector<8x512xf32>
    %61 = arith.addf %57, %60 : vector<8x512xf32>
    %62 = vector.extract_strided_slice %61 {offsets = [0, 0], sizes = [8, 256], strides = [1, 1]} : vector<8x512xf32> to vector<8x256xf32>
    %63 = arith.negf %62 : vector<8x256xf32>
    %64 = math.exp %63 : vector<8x256xf32>
    %cst_36 = arith.constant 1.000000e+00 : f32
    %65 = vector.broadcast %cst_36 : f32 to vector<8x256xf32>
    %66 = arith.addf %65, %64 : vector<8x256xf32>
    %67 = arith.divf %65, %66 : vector<8x256xf32>
    %68 = vector.extract_strided_slice %61 {offsets = [0, 256], sizes = [8, 128], strides = [1, 1]} : vector<8x512xf32> to vector<8x128xf32>
    %69 = math.tanh %68 : vector<8x128xf32>
    %70 = vector.extract_strided_slice %61 {offsets = [0, 384], sizes = [8, 128], strides = [1, 1]} : vector<8x512xf32> to vector<8x128xf32>
    %71 = arith.negf %70 : vector<8x128xf32>
    %72 = math.exp %71 : vector<8x128xf32>
    %cst_37 = arith.constant 1.000000e+00 : f32
    %73 = vector.broadcast %cst_37 : f32 to vector<8x128xf32>
    %74 = arith.addf %73, %72 : vector<8x128xf32>
    %75 = arith.divf %73, %74 : vector<8x128xf32>
    %76 = vector.extract_strided_slice %67 {offsets = [0, 128], sizes = [8, 128], strides = [1, 1]} : vector<8x256xf32> to vector<8x128xf32>
    %77 = arith.mulf %76, %54 : vector<8x128xf32>
    %78 = vector.extract_strided_slice %67 {offsets = [0, 0], sizes = [8, 128], strides = [1, 1]} : vector<8x256xf32> to vector<8x128xf32>
    %79 = arith.mulf %78, %69 : vector<8x128xf32>
    %80 = arith.addf %77, %79 : vector<8x128xf32>
    %81 = math.tanh %80 : vector<8x128xf32>
    %82 = arith.mulf %75, %81 : vector<8x128xf32>
    %c1_i32 = arith.constant 1 : i32
    %83 = arith.index_cast %c1_i32 : i32 to index
    %c0_38 = arith.constant 0 : index
    %c0_39 = arith.constant 0 : index
    %84 = vector.load %arg7[%83, %c0_38, %c0_39] : memref<8x8x512xf32, #tpu.memory_space<vmem>>, vector<1x8x512xf32>
    %85 = vector.shape_cast %84 : vector<1x8x512xf32> to vector<8x512xf32>
    %86 = arith.truncf %82 : vector<8x128xf32> to vector<8x128xbf16>
    %c0_40 = arith.constant 0 : index
    %c0_41 = arith.constant 0 : index
    %87 = vector.load %arg2[%c0_40, %c0_41] : memref<128x512xbf16, #tpu.memory_space<vmem>>, vector<128x512xbf16>
    %cst_42 = arith.constant dense<0.000000e+00> : vector<8x512xf32>
    %88 = tpu.matmul %86, %87, %cst_42 {dimension_numbers = #tpu.dot_dimension_numbers<[1], [0], [0], [1], [0, 0, 1, 1], [], []>} : vector<8x128xbf16>, vector<128x512xbf16>, vector<8x512xf32> -> vector<8x512xf32>
    %89 = arith.addf %85, %88 : vector<8x512xf32>
    %90 = vector.extract_strided_slice %89 {offsets = [0, 0], sizes = [8, 256], strides = [1, 1]} : vector<8x512xf32> to vector<8x256xf32>
    %91 = arith.negf %90 : vector<8x256xf32>
    %92 = math.exp %91 : vector<8x256xf32>
    %cst_43 = arith.constant 1.000000e+00 : f32
    %93 = vector.broadcast %cst_43 : f32 to vector<8x256xf32>
    %94 = arith.addf %93, %92 : vector<8x256xf32>
    %95 = arith.divf %93, %94 : vector<8x256xf32>
    %96 = vector.extract_strided_slice %89 {offsets = [0, 256], sizes = [8, 128], strides = [1, 1]} : vector<8x512xf32> to vector<8x128xf32>
    %97 = math.tanh %96 : vector<8x128xf32>
    %98 = vector.extract_strided_slice %89 {offsets = [0, 384], sizes = [8, 128], strides = [1, 1]} : vector<8x512xf32> to vector<8x128xf32>
    %99 = arith.negf %98 : vector<8x128xf32>
    %100 = math.exp %99 : vector<8x128xf32>
    %cst_44 = arith.constant 1.000000e+00 : f32
    %101 = vector.broadcast %cst_44 : f32 to vector<8x128xf32>
    %102 = arith.addf %101, %100 : vector<8x128xf32>
    %103 = arith.divf %101, %102 : vector<8x128xf32>
    %104 = vector.extract_strided_slice %95 {offsets = [0, 128], sizes = [8, 128], strides = [1, 1]} : vector<8x256xf32> to vector<8x128xf32>
    %105 = arith.mulf %104, %80 : vector<8x128xf32>
    %106 = vector.extract_strided_slice %95 {offsets = [0, 0], sizes = [8, 128], strides = [1, 1]} : vector<8x256xf32> to vector<8x128xf32>
    %107 = arith.mulf %106, %97 : vector<8x128xf32>
    %108 = arith.addf %105, %107 : vector<8x128xf32>
    %109 = math.tanh %108 : vector<8x128xf32>
    %110 = arith.mulf %103, %109 : vector<8x128xf32>
    %c2_i32 = arith.constant 2 : i32
    %111 = arith.index_cast %c2_i32 : i32 to index
    %c0_45 = arith.constant 0 : index
    %c0_46 = arith.constant 0 : index
    %112 = vector.load %arg7[%111, %c0_45, %c0_46] : memref<8x8x512xf32, #tpu.memory_space<vmem>>, vector<1x8x512xf32>
    %113 = vector.shape_cast %112 : vector<1x8x512xf32> to vector<8x512xf32>
    %114 = arith.truncf %110 : vector<8x128xf32> to vector<8x128xbf16>
    %c0_47 = arith.constant 0 : index
    %c0_48 = arith.constant 0 : index
    %115 = vector.load %arg2[%c0_47, %c0_48] : memref<128x512xbf16, #tpu.memory_space<vmem>>, vector<128x512xbf16>
    %cst_49 = arith.constant dense<0.000000e+00> : vector<8x512xf32>
    %116 = tpu.matmul %114, %115, %cst_49 {dimension_numbers = #tpu.dot_dimension_numbers<[1], [0], [0], [1], [0, 0, 1, 1], [], []>} : vector<8x128xbf16>, vector<128x512xbf16>, vector<8x512xf32> -> vector<8x512xf32>
    %117 = arith.addf %113, %116 : vector<8x512xf32>
    %118 = vector.extract_strided_slice %117 {offsets = [0, 0], sizes = [8, 256], strides = [1, 1]} : vector<8x512xf32> to vector<8x256xf32>
    %119 = arith.negf %118 : vector<8x256xf32>
    %120 = math.exp %119 : vector<8x256xf32>
    %cst_50 = arith.constant 1.000000e+00 : f32
    %121 = vector.broadcast %cst_50 : f32 to vector<8x256xf32>
    %122 = arith.addf %121, %120 : vector<8x256xf32>
    %123 = arith.divf %121, %122 : vector<8x256xf32>
    %124 = vector.extract_strided_slice %117 {offsets = [0, 256], sizes = [8, 128], strides = [1, 1]} : vector<8x512xf32> to vector<8x128xf32>
    %125 = math.tanh %124 : vector<8x128xf32>
    %126 = vector.extract_strided_slice %117 {offsets = [0, 384], sizes = [8, 128], strides = [1, 1]} : vector<8x512xf32> to vector<8x128xf32>
    %127 = arith.negf %126 : vector<8x128xf32>
    %128 = math.exp %127 : vector<8x128xf32>
    %cst_51 = arith.constant 1.000000e+00 : f32
    %129 = vector.broadcast %cst_51 : f32 to vector<8x128xf32>
    %130 = arith.addf %129, %128 : vector<8x128xf32>
    %131 = arith.divf %129, %130 : vector<8x128xf32>
    %132 = vector.extract_strided_slice %123 {offsets = [0, 128], sizes = [8, 128], strides = [1, 1]} : vector<8x256xf32> to vector<8x128xf32>
    %133 = arith.mulf %132, %108 : vector<8x128xf32>
    %134 = vector.extract_strided_slice %123 {offsets = [0, 0], sizes = [8, 128], strides = [1, 1]} : vector<8x256xf32> to vector<8x128xf32>
    %135 = arith.mulf %134, %125 : vector<8x128xf32>
    %136 = arith.addf %133, %135 : vector<8x128xf32>
    %137 = math.tanh %136 : vector<8x128xf32>
    %138 = arith.mulf %131, %137 : vector<8x128xf32>
    %c3_i32 = arith.constant 3 : i32
    %139 = arith.index_cast %c3_i32 : i32 to index
    %c0_52 = arith.constant 0 : index
    %c0_53 = arith.constant 0 : index
    %140 = vector.load %arg7[%139, %c0_52, %c0_53] : memref<8x8x512xf32, #tpu.memory_space<vmem>>, vector<1x8x512xf32>
    %141 = vector.shape_cast %140 : vector<1x8x512xf32> to vector<8x512xf32>
    %142 = arith.truncf %138 : vector<8x128xf32> to vector<8x128xbf16>
    %c0_54 = arith.constant 0 : index
    %c0_55 = arith.constant 0 : index
    %143 = vector.load %arg2[%c0_54, %c0_55] : memref<128x512xbf16, #tpu.memory_space<vmem>>, vector<128x512xbf16>
    %cst_56 = arith.constant dense<0.000000e+00> : vector<8x512xf32>
    %144 = tpu.matmul %142, %143, %cst_56 {dimension_numbers = #tpu.dot_dimension_numbers<[1], [0], [0], [1], [0, 0, 1, 1], [], []>} : vector<8x128xbf16>, vector<128x512xbf16>, vector<8x512xf32> -> vector<8x512xf32>
    %145 = arith.addf %141, %144 : vector<8x512xf32>
    %146 = vector.extract_strided_slice %145 {offsets = [0, 0], sizes = [8, 256], strides = [1, 1]} : vector<8x512xf32> to vector<8x256xf32>
    %147 = arith.negf %146 : vector<8x256xf32>
    %148 = math.exp %147 : vector<8x256xf32>
    %cst_57 = arith.constant 1.000000e+00 : f32
    %149 = vector.broadcast %cst_57 : f32 to vector<8x256xf32>
    %150 = arith.addf %149, %148 : vector<8x256xf32>
    %151 = arith.divf %149, %150 : vector<8x256xf32>
    %152 = vector.extract_strided_slice %145 {offsets = [0, 256], sizes = [8, 128], strides = [1, 1]} : vector<8x512xf32> to vector<8x128xf32>
    %153 = math.tanh %152 : vector<8x128xf32>
    %154 = vector.extract_strided_slice %145 {offsets = [0, 384], sizes = [8, 128], strides = [1, 1]} : vector<8x512xf32> to vector<8x128xf32>
    %155 = arith.negf %154 : vector<8x128xf32>
    %156 = math.exp %155 : vector<8x128xf32>
    %cst_58 = arith.constant 1.000000e+00 : f32
    %157 = vector.broadcast %cst_58 : f32 to vector<8x128xf32>
    %158 = arith.addf %157, %156 : vector<8x128xf32>
    %159 = arith.divf %157, %158 : vector<8x128xf32>
    %160 = vector.extract_strided_slice %151 {offsets = [0, 128], sizes = [8, 128], strides = [1, 1]} : vector<8x256xf32> to vector<8x128xf32>
    %161 = arith.mulf %160, %136 : vector<8x128xf32>
    %162 = vector.extract_strided_slice %151 {offsets = [0, 0], sizes = [8, 128], strides = [1, 1]} : vector<8x256xf32> to vector<8x128xf32>
    %163 = arith.mulf %162, %153 : vector<8x128xf32>
    %164 = arith.addf %161, %163 : vector<8x128xf32>
    %165 = math.tanh %164 : vector<8x128xf32>
    %166 = arith.mulf %159, %165 : vector<8x128xf32>
    %c4_i32 = arith.constant 4 : i32
    %167 = arith.index_cast %c4_i32 : i32 to index
    %c0_59 = arith.constant 0 : index
    %c0_60 = arith.constant 0 : index
    %168 = vector.load %arg7[%167, %c0_59, %c0_60] : memref<8x8x512xf32, #tpu.memory_space<vmem>>, vector<1x8x512xf32>
    %169 = vector.shape_cast %168 : vector<1x8x512xf32> to vector<8x512xf32>
    %170 = arith.truncf %166 : vector<8x128xf32> to vector<8x128xbf16>
    %c0_61 = arith.constant 0 : index
    %c0_62 = arith.constant 0 : index
    %171 = vector.load %arg2[%c0_61, %c0_62] : memref<128x512xbf16, #tpu.memory_space<vmem>>, vector<128x512xbf16>
    %cst_63 = arith.constant dense<0.000000e+00> : vector<8x512xf32>
    %172 = tpu.matmul %170, %171, %cst_63 {dimension_numbers = #tpu.dot_dimension_numbers<[1], [0], [0], [1], [0, 0, 1, 1], [], []>} : vector<8x128xbf16>, vector<128x512xbf16>, vector<8x512xf32> -> vector<8x512xf32>
    %173 = arith.addf %169, %172 : vector<8x512xf32>
    %174 = vector.extract_strided_slice %173 {offsets = [0, 0], sizes = [8, 256], strides = [1, 1]} : vector<8x512xf32> to vector<8x256xf32>
    %175 = arith.negf %174 : vector<8x256xf32>
    %176 = math.exp %175 : vector<8x256xf32>
    %cst_64 = arith.constant 1.000000e+00 : f32
    %177 = vector.broadcast %cst_64 : f32 to vector<8x256xf32>
    %178 = arith.addf %177, %176 : vector<8x256xf32>
    %179 = arith.divf %177, %178 : vector<8x256xf32>
    %180 = vector.extract_strided_slice %173 {offsets = [0, 256], sizes = [8, 128], strides = [1, 1]} : vector<8x512xf32> to vector<8x128xf32>
    %181 = math.tanh %180 : vector<8x128xf32>
    %182 = vector.extract_strided_slice %173 {offsets = [0, 384], sizes = [8, 128], strides = [1, 1]} : vector<8x512xf32> to vector<8x128xf32>
    %183 = arith.negf %182 : vector<8x128xf32>
    %184 = math.exp %183 : vector<8x128xf32>
    %cst_65 = arith.constant 1.000000e+00 : f32
    %185 = vector.broadcast %cst_65 : f32 to vector<8x128xf32>
    %186 = arith.addf %185, %184 : vector<8x128xf32>
    %187 = arith.divf %185, %186 : vector<8x128xf32>
    %188 = vector.extract_strided_slice %179 {offsets = [0, 128], sizes = [8, 128], strides = [1, 1]} : vector<8x256xf32> to vector<8x128xf32>
    %189 = arith.mulf %188, %164 : vector<8x128xf32>
    %190 = vector.extract_strided_slice %179 {offsets = [0, 0], sizes = [8, 128], strides = [1, 1]} : vector<8x256xf32> to vector<8x128xf32>
    %191 = arith.mulf %190, %181 : vector<8x128xf32>
    %192 = arith.addf %189, %191 : vector<8x128xf32>
    %193 = math.tanh %192 : vector<8x128xf32>
    %194 = arith.mulf %187, %193 : vector<8x128xf32>
    %c5_i32 = arith.constant 5 : i32
    %195 = arith.index_cast %c5_i32 : i32 to index
    %c0_66 = arith.constant 0 : index
    %c0_67 = arith.constant 0 : index
    %196 = vector.load %arg7[%195, %c0_66, %c0_67] : memref<8x8x512xf32, #tpu.memory_space<vmem>>, vector<1x8x512xf32>
    %197 = vector.shape_cast %196 : vector<1x8x512xf32> to vector<8x512xf32>
    %198 = arith.truncf %194 : vector<8x128xf32> to vector<8x128xbf16>
    %c0_68 = arith.constant 0 : index
    %c0_69 = arith.constant 0 : index
    %199 = vector.load %arg2[%c0_68, %c0_69] : memref<128x512xbf16, #tpu.memory_space<vmem>>, vector<128x512xbf16>
    %cst_70 = arith.constant dense<0.000000e+00> : vector<8x512xf32>
    %200 = tpu.matmul %198, %199, %cst_70 {dimension_numbers = #tpu.dot_dimension_numbers<[1], [0], [0], [1], [0, 0, 1, 1], [], []>} : vector<8x128xbf16>, vector<128x512xbf16>, vector<8x512xf32> -> vector<8x512xf32>
    %201 = arith.addf %197, %200 : vector<8x512xf32>
    %202 = vector.extract_strided_slice %201 {offsets = [0, 0], sizes = [8, 256], strides = [1, 1]} : vector<8x512xf32> to vector<8x256xf32>
    %203 = arith.negf %202 : vector<8x256xf32>
    %204 = math.exp %203 : vector<8x256xf32>
    %cst_71 = arith.constant 1.000000e+00 : f32
    %205 = vector.broadcast %cst_71 : f32 to vector<8x256xf32>
    %206 = arith.addf %205, %204 : vector<8x256xf32>
    %207 = arith.divf %205, %206 : vector<8x256xf32>
    %208 = vector.extract_strided_slice %201 {offsets = [0, 256], sizes = [8, 128], strides = [1, 1]} : vector<8x512xf32> to vector<8x128xf32>
    %209 = math.tanh %208 : vector<8x128xf32>
    %210 = vector.extract_strided_slice %201 {offsets = [0, 384], sizes = [8, 128], strides = [1, 1]} : vector<8x512xf32> to vector<8x128xf32>
    %211 = arith.negf %210 : vector<8x128xf32>
    %212 = math.exp %211 : vector<8x128xf32>
    %cst_72 = arith.constant 1.000000e+00 : f32
    %213 = vector.broadcast %cst_72 : f32 to vector<8x128xf32>
    %214 = arith.addf %213, %212 : vector<8x128xf32>
    %215 = arith.divf %213, %214 : vector<8x128xf32>
    %216 = vector.extract_strided_slice %207 {offsets = [0, 128], sizes = [8, 128], strides = [1, 1]} : vector<8x256xf32> to vector<8x128xf32>
    %217 = arith.mulf %216, %192 : vector<8x128xf32>
    %218 = vector.extract_strided_slice %207 {offsets = [0, 0], sizes = [8, 128], strides = [1, 1]} : vector<8x256xf32> to vector<8x128xf32>
    %219 = arith.mulf %218, %209 : vector<8x128xf32>
    %220 = arith.addf %217, %219 : vector<8x128xf32>
    %221 = math.tanh %220 : vector<8x128xf32>
    %222 = arith.mulf %215, %221 : vector<8x128xf32>
    %c6_i32 = arith.constant 6 : i32
    %223 = arith.index_cast %c6_i32 : i32 to index
    %c0_73 = arith.constant 0 : index
    %c0_74 = arith.constant 0 : index
    %224 = vector.load %arg7[%223, %c0_73, %c0_74] : memref<8x8x512xf32, #tpu.memory_space<vmem>>, vector<1x8x512xf32>
    %225 = vector.shape_cast %224 : vector<1x8x512xf32> to vector<8x512xf32>
    %226 = arith.truncf %222 : vector<8x128xf32> to vector<8x128xbf16>
    %c0_75 = arith.constant 0 : index
    %c0_76 = arith.constant 0 : index
    %227 = vector.load %arg2[%c0_75, %c0_76] : memref<128x512xbf16, #tpu.memory_space<vmem>>, vector<128x512xbf16>
    %cst_77 = arith.constant dense<0.000000e+00> : vector<8x512xf32>
    %228 = tpu.matmul %226, %227, %cst_77 {dimension_numbers = #tpu.dot_dimension_numbers<[1], [0], [0], [1], [0, 0, 1, 1], [], []>} : vector<8x128xbf16>, vector<128x512xbf16>, vector<8x512xf32> -> vector<8x512xf32>
    %229 = arith.addf %225, %228 : vector<8x512xf32>
    %230 = vector.extract_strided_slice %229 {offsets = [0, 0], sizes = [8, 256], strides = [1, 1]} : vector<8x512xf32> to vector<8x256xf32>
    %231 = arith.negf %230 : vector<8x256xf32>
    %232 = math.exp %231 : vector<8x256xf32>
    %cst_78 = arith.constant 1.000000e+00 : f32
    %233 = vector.broadcast %cst_78 : f32 to vector<8x256xf32>
    %234 = arith.addf %233, %232 : vector<8x256xf32>
    %235 = arith.divf %233, %234 : vector<8x256xf32>
    %236 = vector.extract_strided_slice %229 {offsets = [0, 256], sizes = [8, 128], strides = [1, 1]} : vector<8x512xf32> to vector<8x128xf32>
    %237 = math.tanh %236 : vector<8x128xf32>
    %238 = vector.extract_strided_slice %229 {offsets = [0, 384], sizes = [8, 128], strides = [1, 1]} : vector<8x512xf32> to vector<8x128xf32>
    %239 = arith.negf %238 : vector<8x128xf32>
    %240 = math.exp %239 : vector<8x128xf32>
    %cst_79 = arith.constant 1.000000e+00 : f32
    %241 = vector.broadcast %cst_79 : f32 to vector<8x128xf32>
    %242 = arith.addf %241, %240 : vector<8x128xf32>
    %243 = arith.divf %241, %242 : vector<8x128xf32>
    %244 = vector.extract_strided_slice %235 {offsets = [0, 128], sizes = [8, 128], strides = [1, 1]} : vector<8x256xf32> to vector<8x128xf32>
    %245 = arith.mulf %244, %220 : vector<8x128xf32>
    %246 = vector.extract_strided_slice %235 {offsets = [0, 0], sizes = [8, 128], strides = [1, 1]} : vector<8x256xf32> to vector<8x128xf32>
    %247 = arith.mulf %246, %237 : vector<8x128xf32>
    %248 = arith.addf %245, %247 : vector<8x128xf32>
    %249 = math.tanh %248 : vector<8x128xf32>
    %250 = arith.mulf %243, %249 : vector<8x128xf32>
    %c7_i32 = arith.constant 7 : i32
    %251 = arith.index_cast %c7_i32 : i32 to index
    %c0_80 = arith.constant 0 : index
    %c0_81 = arith.constant 0 : index
    %252 = vector.load %arg7[%251, %c0_80, %c0_81] : memref<8x8x512xf32, #tpu.memory_space<vmem>>, vector<1x8x512xf32>
    %253 = vector.shape_cast %252 : vector<1x8x512xf32> to vector<8x512xf32>
    %254 = arith.truncf %250 : vector<8x128xf32> to vector<8x128xbf16>
    %c0_82 = arith.constant 0 : index
    %c0_83 = arith.constant 0 : index
    %255 = vector.load %arg2[%c0_82, %c0_83] : memref<128x512xbf16, #tpu.memory_space<vmem>>, vector<128x512xbf16>
    %cst_84 = arith.constant dense<0.000000e+00> : vector<8x512xf32>
    %256 = tpu.matmul %254, %255, %cst_84 {dimension_numbers = #tpu.dot_dimension_numbers<[1], [0], [0], [1], [0, 0, 1, 1], [], []>} : vector<8x128xbf16>, vector<128x512xbf16>, vector<8x512xf32> -> vector<8x512xf32>
    %257 = arith.addf %253, %256 : vector<8x512xf32>
    %258 = vector.extract_strided_slice %257 {offsets = [0, 0], sizes = [8, 256], strides = [1, 1]} : vector<8x512xf32> to vector<8x256xf32>
    %259 = arith.negf %258 : vector<8x256xf32>
    %260 = math.exp %259 : vector<8x256xf32>
    %cst_85 = arith.constant 1.000000e+00 : f32
    %261 = vector.broadcast %cst_85 : f32 to vector<8x256xf32>
    %262 = arith.addf %261, %260 : vector<8x256xf32>
    %263 = arith.divf %261, %262 : vector<8x256xf32>
    %264 = vector.extract_strided_slice %257 {offsets = [0, 256], sizes = [8, 128], strides = [1, 1]} : vector<8x512xf32> to vector<8x128xf32>
    %265 = math.tanh %264 : vector<8x128xf32>
    %266 = vector.extract_strided_slice %257 {offsets = [0, 384], sizes = [8, 128], strides = [1, 1]} : vector<8x512xf32> to vector<8x128xf32>
    %267 = arith.negf %266 : vector<8x128xf32>
    %268 = math.exp %267 : vector<8x128xf32>
    %cst_86 = arith.constant 1.000000e+00 : f32
    %269 = vector.broadcast %cst_86 : f32 to vector<8x128xf32>
    %270 = arith.addf %269, %268 : vector<8x128xf32>
    %271 = arith.divf %269, %270 : vector<8x128xf32>
    %272 = vector.extract_strided_slice %263 {offsets = [0, 128], sizes = [8, 128], strides = [1, 1]} : vector<8x256xf32> to vector<8x128xf32>
    %273 = arith.mulf %272, %248 : vector<8x128xf32>
    %274 = vector.extract_strided_slice %263 {offsets = [0, 0], sizes = [8, 128], strides = [1, 1]} : vector<8x256xf32> to vector<8x128xf32>
    %275 = arith.mulf %274, %265 : vector<8x128xf32>
    %276 = arith.addf %273, %275 : vector<8x128xf32>
    %277 = math.tanh %276 : vector<8x128xf32>
    %278 = arith.mulf %271, %277 : vector<8x128xf32>
    %c8_i32 = arith.constant 8 : i32
    %c0_87 = arith.constant 0 : index
    %c0_88 = arith.constant 0 : index
    %279 = vector.load %arg4[%c0_87, %c0_88] : memref<1x128xf32, #tpu.memory_space<vmem>>, vector<1x128xf32>
    %280 = vector.broadcast %279 : vector<1x128xf32> to vector<8x128xf32>
    %281 = arith.mulf %278, %280 : vector<8x128xf32>
    %cst_89 = arith.constant dense<0.000000e+00> : vector<8xf32>
    %282 = vector.multi_reduction <add>, %281, %cst_89 [1] : vector<8x128xf32> to vector<8xf32>
    %283 = vector.shape_cast %282 : vector<8xf32> to vector<8x1xf32>
    %c0_90 = arith.constant 0 : index
    %c0_91 = arith.constant 0 : index
    %284 = vector.load %arg5[%c0_90, %c0_91] : memref<1x1xf32, #tpu.memory_space<vmem>>, vector<1x1xf32>
    %285 = vector.broadcast %284 : vector<1x1xf32> to vector<8x1xf32>
    %286 = arith.addf %283, %285 : vector<8x1xf32>
    %c0_92 = arith.constant 0 : index
    %c0_93 = arith.constant 0 : index
    %287 = vector.load %arg6[%c0_92, %c0_93] : memref<8x1xf32, #tpu.memory_space<vmem>>, vector<8x1xf32>
    tpu.vector_store %arg6[%c0_92, %c0_93], %286 {strides = array<i32>} : memref<8x1xf32, #tpu.memory_space<vmem>>, vector<8x1xf32>,
    return
  }
}

</mosaic_0001>

<bundles_post_ra>
// kernel: lstm_model_forward.1
= control target key start
LH: loop header
LB: loop body
LE: loop exit
PB: predicated region body
PF: predicated region fallthrough
CT: control target
= control target key end

     0   :  { %s2635_s0 = inlined_call_operand.vmem [shape: f32[64,3], index: 0, kind: input, shape index: {}]   ;;  %s2636_s1 = inlined_call_operand.vmem [shape: f32[3,512], index: 1, kind: input, shape index: {}]   ;;  %s2637_s2 = inlined_call_operand.hbm [shape: bf16[128,512], index: 2, kind: input, shape index: {}]   ;;  %s2638_s3 = inlined_call_operand.vmem [shape: f32[1,512], index: 3, kind: input, shape index: {}]   ;;  %s2639_s4 = inlined_call_operand.vmem [shape: f32[1,128], index: 4, kind: input, shape index: {}]   ;;  %s2640_s5 = inlined_call_operand.<no memory space> [shape: f32[1,1], index: 5, kind: input, shape index: {}]   ;;  %s2641_s6 = inlined_call_operand.vmem [shape: f32[8,1], index: 6, kind: output, shape index: {}]  }
   0x1   :  { %v11_v0 = vstv %s2640_s5 }
   0x2   :  { %12 = vst [vmem:[#allocation3] sm:$0x1] %v11_v0 }
   0x3   :  { %13 = vsyncpa [#allocation5], 0  ;;  %s1927_s23 = smov [#allocation4]   ;;  %s1903_s27 = scalar_lea.hbm %s2637_s2, 4096 }
   0x4   :  { %s23_s24 = sshll.u32 %s1927_s23, 4  ;;  %p1904_p0 = scmp.ne.s32.totalorder %s2637_s2, %s1903_s27  ;;  %s24_s24 = int_to_ptr.vmem [resolvable:$true] %s23_s24 }
   0x5   :  { %p1907_p1 = scmp.lt.u32.totalorder %s1903_s27, %s2637_s2 }
   0x7   :  { %p1909_p2 = pnand %p1907_p1, %p1904_p0 }
   0x9   :  { %1912 = shalt.err (!%p1909_p2)
}
   0xa   :  { %s1913_s5 = scalar_lea.vmem %s24_s24, 4096  ;;  %p1918_p4 = scmp.lt.s32.totalorder %s24_s24, %s24_s24 }
   0xb   :  { %p1914_p3 = scmp.ne.s32.totalorder %s24_s24, %s1913_s5  ;;  %p1919_p5 = scmp.lt.s32.totalorder %s1913_s5, %s1913_s5 }
   0xd   :  { %p1920_p6 = por %p1919_p5, %p1918_p4 }
   0xf   :  { %p1921_p7 = pnand %p1920_p6, %p1914_p3 }
  0x11   :  { %1924 = shalt.err (!%p1921_p7)
}
  0x12   :  { %s1928_s8 = smov 256   ;;  %s1929_s9 = smov 16  }
  0x13   :  { %29 = dma.hbm_to_vmem [thread:$0]  %s2637_s2, 4096, %s24_s24, [#allocation5], %s1928_s8, %s1928_s8, %s1929_s9  }
  0x14   :  { %1925 = dma.done.wait [#allocation5], 4096  }
  0x15   :  { %1926 = vsyncadd [#allocation5], 4294963200  ;;  %v2646_v1 = vmov 0   ;;  %v2644_v2 = vmov 2   ;;  %v1987_v3 = vld [vmem:[#allocation4 + $0x4] ss:$16 sps:$4 sm:$0xff]   ;;  %v42_v39 = vlaneseq }
  0x16   :  { %701 = vmatprep.mubr.bf16.mxu0 %v2646_v1  ;;  %742 = vmatprep.mubr.bf16.mxu1 %v2646_v1  ;;  %2687 = vst [vmem:[#allocation7_spill] sm:$0xff] %v1987_v3  ;;  %v1989_v4 = vld [vmem:[#allocation4 + $0xc] ss:$16 sps:$4 sm:$0xff]   ;;  %v1992_v5 = vld [vmem:[#allocation4] ss:$16 sps:$4 sm:$0xff]   ;;  %v2642_v34 = vmov 1  }
  0x17   :  { %1675 = vset.pattern.permute.xlu0 %v2646_v1  ;;  %1677 = vset.pattern.permute.xlu1 %v2644_v2  ;;  %2688 = vst [vmem:[#allocation8_spill] sm:$0xff] %v1989_v4  ;;  %v1994_v6 = vld [vmem:[#allocation4 + $0x8] ss:$16 sps:$4 sm:$0xff]   ;;  %v1997_v7 = vld [vmem:[#allocation4 + $0x24] ss:$16 sps:$4 sm:$0xff]   ;;  %v43_v40 = vshrl.u32 %v42_v39, 7 }
  0x18   :  { %669 = vmatprep.subr.bf16.mxu0 %v1987_v3  ;;  %710 = vmatprep.subr.bf16.mxu1 %v1989_v4  ;;  %v2001_v8 = vld [vmem:[#allocation4 + $0x2c] ss:$16 sps:$4 sm:$0xff]   ;;  %v2003_v9 = vld [vmem:[#allocation4 + $0x20] ss:$16 sps:$4 sm:$0xff]   ;;  %v2006_v10 = vld [vmem:[#allocation4 + $0x28] ss:$16 sps:$4 sm:$0xff]  }
  0x19   :  { %670 = vmatpush1.bf16.msra.mxu0 %v1992_v5  ;;  %711 = vmatpush1.bf16.msra.mxu1 %v1994_v6  ;;  %v2009_v11 = vld [vmem:[#allocation4 + $0x44] ss:$16 sps:$4 sm:$0xff]   ;;  %v2011_v12 = vld [vmem:[#allocation4 + $0x4c] ss:$16 sps:$4 sm:$0xff]   ;;  %v2013_v13 = vld [vmem:[#allocation4 + $0x40] ss:$16 sps:$4 sm:$0xff]  }
  0x1a   :  { %671 = vmatprep.subr.bf16.mxu0 %v1997_v7  ;;  %712 = vmatprep.subr.bf16.mxu1 %v2001_v8  ;;  %v2015_v14 = vld [vmem:[#allocation4 + $0x48] ss:$16 sps:$4 sm:$0xff]   ;;  %v2019_v15 = vld [vmem:[#allocation4 + $0x64] ss:$16 sps:$4 sm:$0xff]   ;;  %v2023_v16 = vld [vmem:[#allocation4 + $0x6c] ss:$16 sps:$4 sm:$0xff]  }
  0x1b   :  { %v2025_v17 = vld [vmem:[#allocation4 + $0x60] ss:$16 sps:$4 sm:$0xff]   ;;  %v2029_v18 = vld [vmem:[#allocation4 + $0x68] ss:$16 sps:$4 sm:$0xff]   ;;  %v2031_v19 = vld [vmem:[#allocation4 + $0x84] ss:$16 sps:$4 sm:$0xff]  }
  0x1c   :  { %v2035_v20 = vld [vmem:[#allocation4 + $0x8c] ss:$16 sps:$4 sm:$0xff]   ;;  %v2037_v21 = vld [vmem:[#allocation4 + $0x80] ss:$16 sps:$4 sm:$0xff]   ;;  %v2039_v22 = vld [vmem:[#allocation4 + $0x88] ss:$16 sps:$4 sm:$0xff]  }
  0x1d   :  { %672 = vmatpush1.bf16.msra.mxu0 %v2003_v9  ;;  %713 = vmatpush1.bf16.msra.mxu1 %v2006_v10  ;;  %v2043_v23 = vld [vmem:[#allocation4 + $0xa4] ss:$16 sps:$4 sm:$0xff]   ;;  %v2047_v24 = vld [vmem:[#allocation4 + $0xac] ss:$16 sps:$4 sm:$0xff]   ;;  %v2051_v25 = vld [vmem:[#allocation4 + $0xa0] ss:$16 sps:$4 sm:$0xff]  }
  0x1e   :  { %673 = vmatprep.subr.bf16.mxu0 %v2009_v11  ;;  %714 = vmatprep.subr.bf16.mxu1 %v2011_v12  ;;  %v2053_v26 = vld [vmem:[#allocation4 + $0xa8] ss:$16 sps:$4 sm:$0xff]   ;;  %v2057_v27 = vld [vmem:[#allocation4 + $0xc4] ss:$16 sps:$4 sm:$0xff]   ;;  %v2059_v28 = vld [vmem:[#allocation4 + $0xcc] ss:$16 sps:$4 sm:$0xff]  }
  0x1f   :  { %v62_v29 = vld [vmem:[%s2635_s0] sm:$0xff]  ;;  %v2068_v31 = vld [vmem:[#allocation4 + $0xc8] ss:$16 sps:$4 sm:$0xff]   ;;  %v64_v38 = vld [vmem:[%s2635_s0 + $0x10] sm:$0xff]  ;;  %v44_v41 = vsub.s32 0, %v43_v40  ;;  %v48_v42 = vsub.s32 1, %v43_v40 }
  0x20   :  { %73 = vperm.xlu0 %1675, %v62_v29   ;;  %318 = vperm.xlu1 %1677, %v62_v29   ;;  %v2066_v30 = vld [vmem:[#allocation4 + $0xc0] ss:$16 sps:$4 sm:$0xff]   ;;  %v2072_v32 = vld [vmem:[#allocation4 + $0xe4] ss:$16 sps:$4 sm:$0xff]   ;;  %v2074_v33 = vld [vmem:[#allocation4 + $0xec] ss:$16 sps:$4 sm:$0xff]  }
  0x21   :  { %674 = vmatpush1.bf16.msra.mxu0 %v2013_v13  ;;  %715 = vmatpush1.bf16.msra.mxu1 %v2015_v14  ;;  %v2080_v35 = vld [vmem:[#allocation4 + $0xe0] ss:$16 sps:$4 sm:$0xff]   ;;  %v2082_v36 = vld [vmem:[#allocation4 + $0xe8] ss:$16 sps:$4 sm:$0xff]   ;;  %v56_v49 = vsub.s32 3, %v43_v40  ;;  %v52_v59 = vsub.s32 2, %v43_v40 }
  0x22   :  { %675 = vmatprep.subr.bf16.mxu0 %v2019_v15  ;;  %716 = vmatprep.subr.bf16.mxu1 %v2023_v16  ;;  %v63_v37 = vld [vmem:[%s2635_s0 + $0x8] sm:$0xff]  ;;  %v40_v48 = vld [vmem:[%s2638_s3] sm:$0xf]  ;;  %vm1602_vm0 = vcmask 7168  }
  0x23   :  { %v70_v43 = vld [vmem:[%s2636_s1] ss:$4 sm:$0xf]  ;;  %v1609_v47 = vld [vmem:[%s2636_s1 + $0x1] ss:$4 sm:$0xf]  ;;  %v2154_v52 = vrot.slane %v40_v48, %v44_v41  ;;  %v2162_v57 = vrot.slane %v40_v48, %v48_v42 }
  0x24   :  { %1676 = vset.pattern.permute.xlu0 %v2642_v34  ;;  %1678 = vset.pattern.permute.xlu1 %v2646_v1  ;;  %v2141_v45 = vrot.slane %v70_v43, %v44_v41  ;;  %v2143_v46 = vrot.slane %v70_v43, %v48_v42  ;;  %v2152_v51 = vrot.slane %v1609_v47, %v44_v41  ;;  %v1610_v56 = vld [vmem:[%s2636_s1 + $0x2] ss:$4 sm:$0xf] }
  0x25   :  { %676 = vmatpush1.bf16.msra.mxu0 %v2025_v17  ;;  %717 = vmatpush1.bf16.msra.mxu1 %v2029_v18  ;;  %2692 = vst [vmem:[#allocation12_spill] sm:$0xff] %v2154_v52  ;;  %v2157_v54 = vrot.slane %v1609_v47, %v48_v42  ;;  %2694 = vst [vmem:[#allocation14_spill] sm:$0xff] %v2162_v57  ;;  %v2164_v58 = vrot.slane %v70_v43, %v56_v49 }
  0x26   :  { %677 = vmatprep.subr.bf16.mxu0 %v2031_v19  ;;  %718 = vmatprep.subr.bf16.mxu1 %v2035_v20  ;;  %2689 = vst [vmem:[#allocation9_spill] sm:$0xff] %v2141_v45  ;;  %2690 = vst [vmem:[#allocation10_spill] sm:$0xff] %v2143_v46  ;;  %v2168_v62 = vrot.slane %v1610_v56, %v44_v41  ;;  %v2175_v39 = vrot.slane %v1609_v47, %v56_v49 }
  0x27   :  { %199 = vperm.xlu0 %1676, %v62_v29   ;;  %78 = vperm.xlu1 %1678, %v63_v37   ;;  %2691 = vst [vmem:[#allocation11_spill] sm:$0xff] %v2152_v51  ;;  %2693 = vst [vmem:[#allocation13_spill] sm:$0xff] %v2157_v54  ;;  %v2179_v40 = vrot.slane %v70_v43, %v52_v59 }
  0x28   :  { %2695 = vst [vmem:[#allocation15_spill] sm:$0xff] %v2164_v58  ;;  %2696 = vst [vmem:[#allocation16_spill] sm:$0xff] %v2168_v62 }
  0x29   :  { %678 = vmatpush1.bf16.msra.mxu0 %v2037_v21  ;;  %719 = vmatpush1.bf16.msra.mxu1 %v2039_v22  ;;  %2698 = vst [vmem:[#allocation18_spill] sm:$0xff] %v2175_v39  ;;  %2700 = vst [vmem:[#allocation20_spill] sm:$0xff] %v2179_v40 }
  0x2a   :  { %679 = vmatprep.subr.bf16.mxu0 %v2043_v23  ;;  %720 = vmatprep.subr.bf16.mxu1 %v2047_v24 }
  0x2b   :  { %1680 = vset.pattern.permute.xlu0 %v2644_v2  ;;  %1679 = vset.pattern.permute.xlu1 %v2642_v34 }
  0x2c   :  { %322 = vperm.xlu0 %1680, %v63_v37   ;;  %203 = vperm.xlu1 %1679, %v63_v37   ;;  %v2172_v37 = vrot.slane %v1610_v56, %v48_v42  ;;  %v2185_v42 = vrot.slane %v1610_v56, %v56_v49 }
  0x2d   :  { %680 = vmatpush1.bf16.msra.mxu0 %v2051_v25  ;;  %721 = vmatpush1.bf16.msra.mxu1 %v2053_v26 }
  0x2e   :  { %681 = vmatprep.subr.bf16.mxu0 %v2057_v27  ;;  %722 = vmatprep.subr.bf16.mxu1 %v2059_v28  ;;  %2697 = vst [vmem:[#allocation17_spill] sm:$0xff] %v2172_v37 }
  0x30   :  { %326 = vperm.xlu0 %1680, %v64_v38   ;;  %1681 = vset.pattern.permute.xlu1 %v2646_v1 }
  0x31   :  { %682 = vmatpush1.bf16.msra.mxu0 %v2066_v30  ;;  %723 = vmatpush1.bf16.msra.mxu1 %v2068_v31 }
  0x32   :  { %683 = vmatprep.subr.bf16.mxu0 %v2072_v32  ;;  %724 = vmatprep.subr.bf16.mxu1 %v2074_v33 }
  0x33   :  { %83 = vperm.xlu1 %1681, %v64_v38  }
  0x34   :  { %1684 = vset.pattern.permute.xlu0 %v2642_v34 }
  0x35   :  { %684 = vmatpush1.bf16.msra.mxu0 %v2080_v35  ;;  %725 = vmatpush1.bf16.msra.mxu1 %v2082_v36 }
  0x36   :  { %784 = vmatprep.subr.bf16.mxu0 %v1987_v3  ;;  %825 = vmatprep.subr.bf16.mxu1 %v1989_v4 }
  0x37   :  { %1682 = vset.pattern.permute.xlu1 %v2642_v34  ;;  %v2177_v34 = vrot.slane %v40_v48, %v56_v49 }
  0x38   :  { %702 = vmatmul.mubr.bf16.vlgmr.msra.gmra.mrb[0].mxu0 %v2646_v1  ;;  %743 = vmatmul.mubr.bf16.vlgmr.msra.gmra.mrb[0].mxu1 %v2646_v1 }
  0x39   :  { %785 = vmatpush1.bf16.msra.mxu0 %v1992_v5  ;;  %826 = vmatpush1.bf16.msra.mxu1 %v1994_v6  ;;  %2699 = vst [vmem:[#allocation19_spill] sm:$0xff] %v2177_v34 }
  0x3a   :  { %786 = vmatprep.subr.bf16.mxu0 %v1997_v7  ;;  %827 = vmatprep.subr.bf16.mxu1 %v2001_v8 }
  0x3b   :  { %816 = vmatprep.mubr.bf16.mxu0 %v2646_v1  ;;  %857 = vmatprep.mubr.bf16.mxu1 %v2646_v1 }
  0x3c   :  { %207 = vperm.xlu1 %1682, %v64_v38  }
  0x3d   :  { %787 = vmatpush1.bf16.msra.mxu0 %v2003_v9  ;;  %828 = vmatpush1.bf16.msra.mxu1 %v2006_v10 }
  0x3e   :  { %788 = vmatprep.subr.bf16.mxu0 %v2009_v11  ;;  %829 = vmatprep.subr.bf16.mxu1 %v2011_v12 }
  0x40   :  { %1683 = vset.pattern.permute.xlu1 %v2646_v1 }
  0x41   :  { %789 = vmatpush1.bf16.msra.mxu0 %v2013_v13  ;;  %830 = vmatpush1.bf16.msra.mxu1 %v2015_v14 }
  0x42   :  { %790 = vmatprep.subr.bf16.mxu0 %v2019_v15  ;;  %831 = vmatprep.subr.bf16.mxu1 %v2023_v16 }
  0x45   :  { %791 = vmatpush1.bf16.msra.mxu0 %v2025_v17  ;;  %832 = vmatpush1.bf16.msra.mxu1 %v2029_v18 }
  0x46   :  { %792 = vmatprep.subr.bf16.mxu0 %v2031_v19  ;;  %833 = vmatprep.subr.bf16.mxu1 %v2035_v20 }
  0x49   :  { %793 = vmatpush1.bf16.msra.mxu0 %v2037_v21  ;;  %834 = vmatpush1.bf16.msra.mxu1 %v2039_v22 }
  0x4a   :  { %794 = vmatprep.subr.bf16.mxu0 %v2043_v23  ;;  %835 = vmatprep.subr.bf16.mxu1 %v2047_v24 }
  0x4d   :  { %795 = vmatpush1.bf16.msra.mxu0 %v2051_v25  ;;  %836 = vmatpush1.bf16.msra.mxu1 %v2053_v26 }
  0x4e   :  { %796 = vmatprep.subr.bf16.mxu0 %v2057_v27  ;;  %837 = vmatprep.subr.bf16.mxu1 %v2059_v28 }
  0x51   :  { %797 = vmatpush1.bf16.msra.mxu0 %v2066_v30  ;;  %838 = vmatpush1.bf16.msra.mxu1 %v2068_v31 }
  0x52   :  { %798 = vmatprep.subr.bf16.mxu0 %v2072_v32  ;;  %839 = vmatprep.subr.bf16.mxu1 %v2074_v33 }
  0x55   :  { %799 = vmatpush1.bf16.msra.mxu0 %v2080_v35  ;;  %840 = vmatpush1.bf16.msra.mxu1 %v2082_v36 }
  0x56   :  { %899 = vmatprep.subr.bf16.mxu0 %v1987_v3  ;;  %940 = vmatprep.subr.bf16.mxu1 %v1989_v4 }
  0x9f   :  { %v74_v44 = vpop.permute.xlu0 %73  ;;  %v319_v0 = vpop.permute.xlu1 %318 }
  0xa0   :  { %v132_v50 = vmul.f32 %v2141_v45, %v74_v44  ;;  %v133_v53 = vmul.f32 %v2143_v46, %v74_v44  ;;  %v135_v38 = vmul.f32 %v2164_v58, %v74_v44  ;;  %v371_v1 = vmul.f32 %v2172_v37, %v319_v0 }
  0xa1   :  { %v134_v58 = vmul.f32 %v2179_v40, %v74_v44 }
  0xa2   :  { %v164_v61 = vadd.f32 %v132_v50, %v2154_v52  ;;  %v165_v29 = vadd.f32 %v133_v53, %v2162_v57  ;;  %v370_v50 = vmul.f32 %v2168_v62, %v319_v0  ;;  %v167_v53 = vadd.f32 %v135_v38, %v2177_v34 }
  0xa3   :  { %v2188_v57 = vrot.slane %v1609_v47, %v52_v59 }
  0xa6   :  { %v200_v55 = vpop.permute.xlu0 %199 }
  0xa7   :  { %v251_v60 = vmul.f32 %v2152_v51, %v200_v55  ;;  %v252_v63 = vmul.f32 %v2157_v54, %v200_v55  ;;  %v254_v54 = vmul.f32 %v2175_v39, %v200_v55  ;;  %v2190_v51 = vrot.slane %v40_v48, %v52_v59 }
  0xa8   :  { %v373_v39 = vmul.f32 %v2185_v42, %v319_v0  ;;  %v253_v34 = vmul.f32 %v2188_v57, %v200_v55 }
  0xa9   :  { %v283_v2 = vadd.f32 %v251_v60, %v164_v61  ;;  %v284_v41 = vadd.f32 %v252_v63, %v165_v29  ;;  %v286_v46 = vadd.f32 %v254_v54, %v167_v53  ;;  %v166_v47 = vadd.f32 %v134_v58, %v2190_v51 }
  0xab   :  { %v402_v52 = vadd.f32 %v370_v50, %v283_v2  ;;  %v403_v61 = vadd.f32 %v371_v1, %v284_v41  ;;  %v2195_v2 = vrot.slane %v1610_v56, %v52_v59  ;;  %v405_v1 = vadd.f32 %v373_v39, %v286_v46 }
  0xad   :  { %v372_v54 = vmul.f32 %v2195_v2, %v319_v0 }
 0x10b   :  { %v703_v43 = vpop.f32.mrb[0].mxu0  ;;  %v744_v60 = vpop.f32.mrb[0].mxu1 }
 0x10c   :  { %v751_v62 = vadd.f32 %v703_v43, %v402_v52  ;;  %v705_v63 = vpop.f32.mrb[1].mxu0  ;;  %v746_v29 = vpop.f32.mrb[1].mxu1  ;;  %v285_v52 = vadd.f32 %v253_v34, %v166_v47 }
 0x10d   :  { %v752_v37 = vadd.f32 %v705_v63, %v403_v61  ;;  %v707_v38 = vpop.f32.mrb[2].mxu0  ;;  %v748_v49 = vpop.f32.mrb[2].mxu1  ;;  %v754_v41 = vadd.f32 %v746_v29, %v405_v1 }
 0x10e   :  { %v1643_v44 = vmul.f32 -1.442695, %v751_v62  ;;  %v708_v48 = vpop.f32.mrb[3].mxu0  ;;  %v749_v50 = vpop.f32.mrb[3].mxu1  ;;  %v404_v53 = vadd.f32 %v372_v54, %v285_v52  ;;  %v2703_v54 = vld [vmem:[#allocation11_spill] sm:$0xff] }
 0x10f   :  { %v1644_v40 = vmul.f32 -1.442695, %v752_v37  ;;  %v1645_v43 = vmul.f32 -1.442695, %v754_v41  ;;  %v79_v47 = vpop.permute.xlu1 %78  ;;  %v2702_v50 = vld [vmem:[#allocation10_spill] sm:$0xff] }
 0x110   :  { %1743 = vpow2.f32 %v1643_v44  ;;  %v753_v61 = vadd.f32 %v744_v60, %v404_v53  ;;  %v2701_v44 = vmov 0   ;;  %v136_v48 = vmul.f32 %v2141_v45, %v79_v47  ;;  %v2704_v53 = vld [vmem:[#allocation12_spill] sm:$0xff] }
 0x111   :  { %1745 = vpow2.f32 %v1644_v40  ;;  %v137_v1 = vmul.f32 %v2702_v50, %v79_v47 }
 0x112   :  { %1747 = vpow2.f32 %v1645_v43  ;;  %v168_v43 = vadd.f32 %v136_v48, %v2704_v53 }
 0x113   :  { %1749 = vtanh.f32 %v753_v61  ;;  %v204_v52 = vpop.permute.xlu1 %203  ;;  %v2705_v61 = vld [vmem:[#allocation13_spill] sm:$0xff] }
 0x114   :  { %v255_v41 = vmul.f32 %v2703_v54, %v204_v52  ;;  %v2712_v54 = vld [vmem:[#allocation20_spill] sm:$0xff] }
 0x115   :  { %v138_v45 = vmul.f32 %v2712_v54, %v79_v47 }
 0x11a   :  { %v1744_v63 = vpop.eup %1743 }
 0x11b   :  { %v1746_v55 = vpop.eup %1745  ;;  %v761_v62 = vadd.f32 1.0, %v1744_v63  ;;  %v256_v63 = vmul.f32 %v2705_v61, %v204_v52 }
 0x11c   :  { %v762_v56 = vadd.f32 1.0, %v1746_v55  ;;  %v1748_v58 = vpop.eup %1747  ;;  %v323_v55 = vpop.permute.xlu0 %322 }
 0x11d   :  { %1751 = vrcp.f32 %v761_v62  ;;  %v1750_v59 = vpop.eup %1749  ;;  %v771_v34 = vadd.f32 1.0, %v1748_v58  ;;  %v2706_v62 = vld [vmem:[#allocation14_spill] sm:$0xff]  ;;  %v2707_v58 = vld [vmem:[#allocation15_spill] sm:$0xff] }
 0x11e   :  { %1753 = vrcp.f32 %v762_v56  ;;  %v169_v56 = vadd.f32 %v137_v1, %v2706_v62 }
 0x11f   :  { %1755 = vrcp.f32 %v771_v34 }
 0x120   :  { %v288_v34 = vadd.f32 %v256_v63, %v169_v56 }
 0x127   :  { %v1752_v37 = vpop.eup %1751 }
 0x128   :  { %v1754_v40 = vpop.eup %1753  ;;  %v775_v46 = vmul.f32 %v1752_v37, %v1750_v59  ;;  %v139_v59 = vmul.f32 %v2707_v58, %v79_v47  ;;  %v287_v37 = vadd.f32 %v255_v41, %v168_v43  ;;  %v377_v43 = vmul.f32 %v2185_v42, %v323_v55 }
 0x129   :  { %v774_v39 = vmul.f32 0.0, %v1754_v40  ;;  %v1756_v60 = vpop.eup %1755  ;;  %v2708_v40 = vld [vmem:[#allocation16_spill] sm:$0xff] }
 0x12b   :  { %v2198_v0 = vadd.f32 %v775_v46, %v774_v39  ;;  %v374_v46 = vmul.f32 %v2708_v40, %v323_v55  ;;  %v2709_v39 = vld [vmem:[#allocation17_spill] sm:$0xff] }
 0x12d   :  { %1757 = vtanh.f32 %v2198_v0  ;;  %v406_v48 = vadd.f32 %v374_v46, %v287_v37 }
 0x137   :  { %v1758_v29 = vpop.eup %1757 }
 0x138   :  { %v778_v38 = vmul.f32 %v1758_v29, %v1756_v60  ;;  %v375_v60 = vmul.f32 %v2709_v39, %v323_v55  ;;  %v2710_v29 = vld [vmem:[#allocation18_spill] sm:$0xff]  ;;  %v257_v39 = vmul.f32 %v2188_v57, %v204_v52 }
 0x13a   :  { %v783_v49 = vpack.c.bf16 %v778_v38, %v778_v38  ;;  %v258_v38 = vmul.f32 %v2710_v29, %v204_v52 }
 0x13c   :  { %817 = vmatmul.mubr.bf16.vlgmr.msra.gmra.mrb[4].mxu0 %v783_v49  ;;  %858 = vmatmul.mubr.bf16.vlgmr.msra.gmra.mrb[4].mxu1 %v783_v49  ;;  %v2711_v49 = vld [vmem:[#allocation19_spill] sm:$0xff] }
 0x13d   :  { %900 = vmatpush1.bf16.msra.mxu0 %v1992_v5  ;;  %941 = vmatpush1.bf16.msra.mxu1 %v1994_v6  ;;  %v171_v50 = vadd.f32 %v139_v59, %v2711_v49  ;;  %v170_v59 = vadd.f32 %v138_v45, %v2190_v51 }
 0x13e   :  { %901 = vmatprep.subr.bf16.mxu0 %v1997_v7  ;;  %942 = vmatprep.subr.bf16.mxu1 %v2001_v8 }
 0x13f   :  { %931 = vmatprep.mubr.bf16.mxu0 %v2701_v44  ;;  %972 = vmatprep.mubr.bf16.mxu1 %v2701_v44  ;;  %v290_v41 = vadd.f32 %v258_v38, %v171_v50 }
 0x141   :  { %902 = vmatpush1.bf16.msra.mxu0 %v2003_v9  ;;  %943 = vmatpush1.bf16.msra.mxu1 %v2006_v10  ;;  %v409_v46 = vadd.f32 %v377_v43, %v290_v41 }
 0x142   :  { %903 = vmatprep.subr.bf16.mxu0 %v2009_v11  ;;  %944 = vmatprep.subr.bf16.mxu1 %v2011_v12 }
 0x145   :  { %904 = vmatpush1.bf16.msra.mxu0 %v2013_v13  ;;  %945 = vmatpush1.bf16.msra.mxu1 %v2015_v14 }
 0x146   :  { %905 = vmatprep.subr.bf16.mxu0 %v2019_v15  ;;  %946 = vmatprep.subr.bf16.mxu1 %v2023_v16 }
 0x149   :  { %906 = vmatpush1.bf16.msra.mxu0 %v2025_v17  ;;  %947 = vmatpush1.bf16.msra.mxu1 %v2029_v18 }
 0x14a   :  { %907 = vmatprep.subr.bf16.mxu0 %v2031_v19  ;;  %948 = vmatprep.subr.bf16.mxu1 %v2035_v20 }
 0x14d   :  { %908 = vmatpush1.bf16.msra.mxu0 %v2037_v21  ;;  %949 = vmatpush1.bf16.msra.mxu1 %v2039_v22 }
 0x14e   :  { %909 = vmatprep.subr.bf16.mxu0 %v2043_v23  ;;  %950 = vmatprep.subr.bf16.mxu1 %v2047_v24 }
 0x151   :  { %910 = vmatpush1.bf16.msra.mxu0 %v2051_v25  ;;  %951 = vmatpush1.bf16.msra.mxu1 %v2053_v26 }
 0x152   :  { %911 = vmatprep.subr.bf16.mxu0 %v2057_v27  ;;  %952 = vmatprep.subr.bf16.mxu1 %v2059_v28 }
 0x155   :  { %912 = vmatpush1.bf16.msra.mxu0 %v2066_v30  ;;  %953 = vmatpush1.bf16.msra.mxu1 %v2068_v31 }
 0x156   :  { %913 = vmatprep.subr.bf16.mxu0 %v2072_v32  ;;  %954 = vmatprep.subr.bf16.mxu1 %v2074_v33 }
 0x159   :  { %914 = vmatpush1.bf16.msra.mxu0 %v2080_v35  ;;  %955 = vmatpush1.bf16.msra.mxu1 %v2082_v36 }
 0x15a   :  { %1014 = vmatprep.subr.bf16.mxu0 %v1987_v3  ;;  %1055 = vmatprep.subr.bf16.mxu1 %v1989_v4  ;;  %v407_v4 = vadd.f32 %v375_v60, %v288_v34  ;;  %v376_v34 = vmul.f32 %v2195_v2, %v323_v55 }
 0x20f   :  { %v818_v53 = vpop.f32.mrb[4].mxu0  ;;  %v859_v61 = vpop.f32.mrb[4].mxu1 }
 0x210   :  { %v866_v3 = vadd.f32 %v818_v53, %v406_v48  ;;  %v820_v1 = vpop.f32.mrb[5].mxu0  ;;  %v861_v62 = vpop.f32.mrb[5].mxu1  ;;  %v289_v53 = vadd.f32 %v257_v39, %v170_v59  ;;  %v2714_v59 = vld [vmem:[#allocation8_spill] sm:$0xff] }
 0x211   :  { %v867_v58 = vadd.f32 %v820_v1, %v407_v4  ;;  %v822_v63 = vpop.f32.mrb[6].mxu0  ;;  %v863_v56 = vpop.f32.mrb[6].mxu1  ;;  %v869_v4 = vadd.f32 %v861_v62, %v409_v46  ;;  %v2715_v46 = vmov 2  }
 0x212   :  { %v1646_v29 = vmul.f32 -1.442695, %v866_v3  ;;  %v823_v49 = vpop.f32.mrb[7].mxu0  ;;  %v864_v47 = vpop.f32.mrb[7].mxu1  ;;  %v408_v50 = vadd.f32 %v376_v34, %v289_v53  ;;  %v2716_v53 = vmov 1  }
 0x213   :  { %v1647_v37 = vmul.f32 -1.442695, %v867_v58  ;;  %v1648_v60 = vmul.f32 -1.442695, %v869_v4  ;;  %v65_v47 = vld [vmem:[%s2635_s0 + $0x18] sm:$0xff]  ;;  %v84_v34 = vpop.permute.xlu1 %83 }
 0x214   :  { %1759 = vpow2.f32 %v1646_v29  ;;  %v868_v38 = vadd.f32 %v859_v61, %v408_v50  ;;  %88 = vperm.xlu1 %1683, %v65_v47   ;;  %211 = vperm.xlu0 %1684, %v65_v47   ;;  %v2717_v4 = vld [vmem:[#allocation9_spill] sm:$0xff] }
 0x215   :  { %1761 = vpow2.f32 %v1647_v37  ;;  %v66_v37 = vld [vmem:[%s2635_s0 + $0x20] sm:$0xff]  ;;  %v140_v50 = vmul.f32 %v2717_v4, %v84_v34 }
 0x216   :  { %1763 = vpow2.f32 %v1648_v60  ;;  %v2718_v60 = vld [vmem:[#allocation10_spill] sm:$0xff] }
 0x217   :  { %1765 = vtanh.f32 %v868_v38  ;;  %v141_v38 = vmul.f32 %v2718_v60, %v84_v34  ;;  %v2726_v60 = vld [vmem:[#allocation19_spill] sm:$0xff] }
 0x218   :  { %1685 = vset.pattern.permute.xlu1 %v2715_v46  ;;  %215 = vperm.xlu0 %1684, %v66_v37  }
 0x219   :  { %330 = vperm.xlu1 %1685, %v65_v47   ;;  %v2724_v47 = vld [vmem:[#allocation17_spill] sm:$0xff] }
 0x21c   :  { %1688 = vset.pattern.permute.xlu0 %v2701_v44 }
 0x21d   :  { %1686 = vset.pattern.permute.xlu1 %v2701_v44 }
 0x21e   :  { %v1760_v48 = vpop.eup %1759  ;;  %93 = vperm.xlu1 %1686, %v66_v37  }
 0x21f   :  { %v1762_v1 = vpop.eup %1761  ;;  %v876_v63 = vadd.f32 1.0, %v1760_v48  ;;  %v208_v48 = vpop.permute.xlu1 %207 }
 0x220   :  { %v877_v3 = vadd.f32 1.0, %v1762_v1  ;;  %v1764_v45 = vpop.eup %1763  ;;  %v2719_v1 = vld [vmem:[#allocation11_spill] sm:$0xff] }
 0x221   :  { %1767 = vrcp.f32 %v876_v63  ;;  %v1766_v52 = vpop.eup %1765  ;;  %v886_v39 = vadd.f32 1.0, %v1764_v45  ;;  %v259_v63 = vmul.f32 %v2719_v1, %v208_v48  ;;  %v142_v1 = vmul.f32 %v2712_v54, %v84_v34 }
 0x222   :  { %1769 = vrcp.f32 %v877_v3  ;;  %1687 = vset.pattern.permute.xlu1 %v2715_v46  ;;  %v2720_v3 = vld [vmem:[#allocation12_spill] sm:$0xff] }
 0x223   :  { %1771 = vrcp.f32 %v886_v39  ;;  %334 = vperm.xlu1 %1687, %v66_v37   ;;  %v172_v45 = vadd.f32 %v140_v50, %v2720_v3 }
 0x227   :  { %1689 = vset.pattern.permute.xlu1 %v2716_v53  ;;  %v2725_v53 = vld [vmem:[#allocation18_spill] sm:$0xff] }
 0x228   :  { %v262_v46 = vmul.f32 %v2725_v53, %v208_v48 }
 0x22b   :  { %v1768_v58 = vpop.eup %1767 }
 0x22c   :  { %v1770_v29 = vpop.eup %1769  ;;  %v890_v49 = vmul.f32 %v1768_v58, %v1766_v52  ;;  %v2721_v52 = vld [vmem:[#allocation13_spill] sm:$0xff] }
 0x22d   :  { %v889_v55 = vmul.f32 %v1770_v29, %v2198_v0  ;;  %v1772_v61 = vpop.eup %1771  ;;  %v2713_v0 = vld [vmem:[#allocation7_spill] sm:$0xff]  ;;  %v260_v58 = vmul.f32 %v2721_v52, %v208_v48  ;;  %v327_v29 = vpop.permute.xlu0 %326 }
 0x22e   :  { %v379_v37 = vmul.f32 %v2724_v47, %v327_v29  ;;  %v261_v47 = vmul.f32 %v2188_v57, %v208_v48 }
 0x22f   :  { %v2252_v62 = vadd.f32 %v890_v49, %v889_v55  ;;  %v2722_v49 = vld [vmem:[#allocation14_spill] sm:$0xff]  ;;  %v2723_v55 = vld [vmem:[#allocation15_spill] sm:$0xff] }
 0x230   :  { %v173_v39 = vadd.f32 %v141_v38, %v2722_v49 }
 0x231   :  { %1773 = vtanh.f32 %v2252_v62 }
 0x23b   :  { %v1774_v41 = vpop.eup %1773 }
 0x23c   :  { %v893_v43 = vmul.f32 %v1774_v41, %v1772_v61  ;;  %v143_v61 = vmul.f32 %v2723_v55, %v84_v34  ;;  %v291_v41 = vadd.f32 %v259_v63, %v172_v45  ;;  %v381_v45 = vmul.f32 %v2185_v42, %v327_v29 }
 0x23e   :  { %v898_v56 = vpack.c.bf16 %v893_v43, %v893_v43  ;;  %v378_v43 = vmul.f32 %v2708_v40, %v327_v29  ;;  %v175_v4 = vadd.f32 %v143_v61, %v2726_v60  ;;  %v174_v61 = vadd.f32 %v142_v1, %v2190_v51 }
 0x240   :  { %932 = vmatmul.mubr.bf16.vlgmr.msra.gmra.mrb[8].mxu0 %v898_v56  ;;  %973 = vmatmul.mubr.bf16.vlgmr.msra.gmra.mrb[8].mxu1 %v898_v56  ;;  %v292_v56 = vadd.f32 %v260_v58, %v173_v39  ;;  %v410_v50 = vadd.f32 %v378_v43, %v291_v41  ;;  %v294_v63 = vadd.f32 %v262_v46, %v175_v4 }
 0x241   :  { %1015 = vmatpush1.bf16.msra.mxu0 %v1992_v5  ;;  %1056 = vmatpush1.bf16.msra.mxu1 %v1994_v6 }
 0x242   :  { %1016 = vmatprep.subr.bf16.mxu0 %v1997_v7  ;;  %1057 = vmatprep.subr.bf16.mxu1 %v2001_v8  ;;  %v413_v43 = vadd.f32 %v381_v45, %v294_v63 }
 0x243   :  { %1046 = vmatprep.mubr.bf16.mxu0 %v2701_v44  ;;  %1087 = vmatprep.mubr.bf16.mxu1 %v2701_v44 }
 0x245   :  { %1017 = vmatpush1.bf16.msra.mxu0 %v2003_v9  ;;  %1058 = vmatpush1.bf16.msra.mxu1 %v2006_v10 }
 0x246   :  { %1018 = vmatprep.subr.bf16.mxu0 %v2009_v11  ;;  %1059 = vmatprep.subr.bf16.mxu1 %v2011_v12 }
 0x249   :  { %1019 = vmatpush1.bf16.msra.mxu0 %v2013_v13  ;;  %1060 = vmatpush1.bf16.msra.mxu1 %v2015_v14 }
 0x24a   :  { %1020 = vmatprep.subr.bf16.mxu0 %v2019_v15  ;;  %1061 = vmatprep.subr.bf16.mxu1 %v2023_v16 }
 0x24d   :  { %1021 = vmatpush1.bf16.msra.mxu0 %v2025_v17  ;;  %1062 = vmatpush1.bf16.msra.mxu1 %v2029_v18 }
 0x24e   :  { %1022 = vmatprep.subr.bf16.mxu0 %v2031_v19  ;;  %1063 = vmatprep.subr.bf16.mxu1 %v2035_v20 }
 0x251   :  { %1023 = vmatpush1.bf16.msra.mxu0 %v2037_v21  ;;  %1064 = vmatpush1.bf16.msra.mxu1 %v2039_v22 }
 0x252   :  { %1024 = vmatprep.subr.bf16.mxu0 %v2043_v23  ;;  %1065 = vmatprep.subr.bf16.mxu1 %v2047_v24 }
 0x255   :  { %1025 = vmatpush1.bf16.msra.mxu0 %v2051_v25  ;;  %1066 = vmatpush1.bf16.msra.mxu1 %v2053_v26 }
 0x256   :  { %1026 = vmatprep.subr.bf16.mxu0 %v2057_v27  ;;  %1067 = vmatprep.subr.bf16.mxu1 %v2059_v28 }
 0x259   :  { %1027 = vmatpush1.bf16.msra.mxu0 %v2066_v30  ;;  %1068 = vmatpush1.bf16.msra.mxu1 %v2068_v31 }
 0x25a   :  { %1028 = vmatprep.subr.bf16.mxu0 %v2072_v32  ;;  %1069 = vmatprep.subr.bf16.mxu1 %v2074_v33 }
 0x25d   :  { %1029 = vmatpush1.bf16.msra.mxu0 %v2080_v35  ;;  %1070 = vmatpush1.bf16.msra.mxu1 %v2082_v36 }
 0x25e   :  { %1129 = vmatprep.subr.bf16.mxu0 %v2713_v0  ;;  %1170 = vmatprep.subr.bf16.mxu1 %v2714_v59  ;;  %v411_v59 = vadd.f32 %v379_v37, %v292_v56  ;;  %v380_v56 = vmul.f32 %v2195_v2, %v327_v29 }
 0x313   :  { %v933_v3 = vpop.f32.mrb[8].mxu0  ;;  %v974_v52 = vpop.f32.mrb[8].mxu1 }
 0x314   :  { %v981_v0 = vadd.f32 %v933_v3, %v410_v50  ;;  %v935_v38 = vpop.f32.mrb[9].mxu0  ;;  %v976_v49 = vpop.f32.mrb[9].mxu1  ;;  %v293_v3 = vadd.f32 %v261_v47, %v174_v61 }
 0x315   :  { %v982_v55 = vadd.f32 %v935_v38, %v411_v59  ;;  %v937_v58 = vpop.f32.mrb[10].mxu0  ;;  %v978_v39 = vpop.f32.mrb[10].mxu1  ;;  %v984_v59 = vadd.f32 %v976_v49, %v413_v43 }
 0x316   :  { %v1649_v53 = vmul.f32 -1.442695, %v981_v0  ;;  %v938_v60 = vpop.f32.mrb[11].mxu0  ;;  %v979_v34 = vpop.f32.mrb[11].mxu1  ;;  %v412_v46 = vadd.f32 %v380_v56, %v293_v3 }
 0x317   :  { %v1650_v41 = vmul.f32 -1.442695, %v982_v55  ;;  %v1651_v4 = vmul.f32 -1.442695, %v984_v59  ;;  %v2738_v34 = vld [vmem:[#allocation19_spill] sm:$0xff] }
 0x318   :  { %1775 = vpow2.f32 %v1649_v53  ;;  %v983_v37 = vadd.f32 %v974_v52, %v412_v46 }
 0x319   :  { %1777 = vpow2.f32 %v1650_v41 }
 0x31a   :  { %1779 = vpow2.f32 %v1651_v4 }
 0x31b   :  { %1781 = vtanh.f32 %v983_v37 }
 0x322   :  { %v1776_v50 = vpop.eup %1775 }
 0x323   :  { %v1778_v38 = vpop.eup %1777  ;;  %v991_v58 = vadd.f32 1.0, %v1776_v50 }
 0x324   :  { %v992_v0 = vadd.f32 1.0, %v1778_v38  ;;  %v1780_v60 = vpop.eup %1779 }
 0x325   :  { %1783 = vrcp.f32 %v991_v58  ;;  %v1782_v48 = vpop.eup %1781  ;;  %v1001_v47 = vadd.f32 1.0, %v1780_v60 }
 0x326   :  { %1785 = vrcp.f32 %v992_v0 }
 0x327   :  { %1787 = vrcp.f32 %v1001_v47 }
 0x32f   :  { %v1784_v53 = vpop.eup %1783 }
 0x330   :  { %v1786_v1 = vpop.eup %1785  ;;  %v1005_v55 = vmul.f32 %v1784_v53, %v1782_v48 }
 0x331   :  { %v1004_v29 = vmul.f32 %v1786_v1, %v2252_v62  ;;  %v1788_v52 = vpop.eup %1787  ;;  %v2737_v62 = vld [vmem:[#allocation18_spill] sm:$0xff] }
 0x333   :  { %v2317_v49 = vadd.f32 %v1005_v55, %v1004_v29 }
 0x335   :  { %1789 = vtanh.f32 %v2317_v49 }
 0x33f   :  { %v1790_v63 = vpop.eup %1789 }
 0x340   :  { %v1008_v45 = vmul.f32 %v1790_v63, %v1788_v52 }
 0x342   :  { %v1013_v39 = vpack.c.bf16 %v1008_v45, %v1008_v45 }
 0x344   :  { %1047 = vmatmul.mubr.bf16.vlgmr.msra.gmra.mrb[12].mxu0 %v1013_v39  ;;  %1088 = vmatmul.mubr.bf16.vlgmr.msra.gmra.mrb[12].mxu1 %v1013_v39 }
 0x345   :  { %1130 = vmatpush1.bf16.msra.mxu0 %v1992_v5  ;;  %1171 = vmatpush1.bf16.msra.mxu1 %v1994_v6  ;;  %v2727_v5 = vld [vmem:[#allocation7_spill] sm:$0xff]  ;;  %v2728_v6 = vld [vmem:[#allocation8_spill] sm:$0xff] }
 0x346   :  { %1131 = vmatprep.subr.bf16.mxu0 %v1997_v7  ;;  %1172 = vmatprep.subr.bf16.mxu1 %v2001_v8  ;;  %v89_v7 = vpop.permute.xlu1 %88  ;;  %v2729_v8 = vld [vmem:[#allocation9_spill] sm:$0xff] }
 0x347   :  { %1161 = vmatprep.mubr.bf16.mxu0 %v2701_v44  ;;  %1202 = vmatprep.mubr.bf16.mxu1 %v2701_v44  ;;  %v146_v43 = vmul.f32 %v2712_v54, %v89_v7 }
 0x349   :  { %1132 = vmatpush1.bf16.msra.mxu0 %v2003_v9  ;;  %1173 = vmatpush1.bf16.msra.mxu1 %v2006_v10  ;;  %v144_v9 = vmul.f32 %v2729_v8, %v89_v7  ;;  %v2730_v10 = vld [vmem:[#allocation10_spill] sm:$0xff]  ;;  %v178_v58 = vadd.f32 %v146_v43, %v2190_v51 }
 0x34a   :  { %1133 = vmatprep.subr.bf16.mxu0 %v2009_v11  ;;  %1174 = vmatprep.subr.bf16.mxu1 %v2011_v12  ;;  %v145_v11 = vmul.f32 %v2730_v10, %v89_v7  ;;  %v212_v12 = vpop.permute.xlu0 %211 }
 0x34b   :  { %v266_v61 = vmul.f32 %v2737_v62, %v212_v12  ;;  %v265_v50 = vmul.f32 %v2188_v57, %v212_v12 }
 0x34d   :  { %1134 = vmatpush1.bf16.msra.mxu0 %v2013_v13  ;;  %1175 = vmatpush1.bf16.msra.mxu1 %v2015_v14  ;;  %v2731_v13 = vld [vmem:[#allocation11_spill] sm:$0xff]  ;;  %v297_v45 = vadd.f32 %v265_v50, %v178_v58 }
 0x34e   :  { %1135 = vmatprep.subr.bf16.mxu0 %v2019_v15  ;;  %1176 = vmatprep.subr.bf16.mxu1 %v2023_v16  ;;  %v263_v14 = vmul.f32 %v2731_v13, %v212_v12  ;;  %v2732_v15 = vld [vmem:[#allocation12_spill] sm:$0xff]  ;;  %v2394_v50 = vld [vmem:[#allocation4 + $0x44] ss:$16 sps:$4 sm:$0xff]   ;;  %v2400_v58 = vld [vmem:[#allocation4 + $0x40] ss:$16 sps:$4 sm:$0xff]  }
 0x34f   :  { %v176_v16 = vadd.f32 %v144_v9, %v2732_v15 }
 0x351   :  { %1136 = vmatpush1.bf16.msra.mxu0 %v2025_v17  ;;  %1177 = vmatpush1.bf16.msra.mxu1 %v2029_v18  ;;  %v2733_v17 = vld [vmem:[#allocation13_spill] sm:$0xff] }
 0x352   :  { %1137 = vmatprep.subr.bf16.mxu0 %v2031_v19  ;;  %1178 = vmatprep.subr.bf16.mxu1 %v2035_v20  ;;  %v264_v18 = vmul.f32 %v2733_v17, %v212_v12  ;;  %v2734_v19 = vld [vmem:[#allocation14_spill] sm:$0xff] }
 0x353   :  { %v177_v20 = vadd.f32 %v145_v11, %v2734_v19 }
 0x355   :  { %1138 = vmatpush1.bf16.msra.mxu0 %v2037_v21  ;;  %1179 = vmatpush1.bf16.msra.mxu1 %v2039_v22  ;;  %v2735_v21 = vld [vmem:[#allocation15_spill] sm:$0xff] }
 0x356   :  { %1139 = vmatprep.subr.bf16.mxu0 %v2043_v23  ;;  %1180 = vmatprep.subr.bf16.mxu1 %v2047_v24  ;;  %v147_v22 = vmul.f32 %v2735_v21, %v89_v7  ;;  %v331_v23 = vpop.permute.xlu1 %330  ;;  %v295_v24 = vadd.f32 %v263_v14, %v176_v16 }
 0x357   :  { %v385_v37 = vmul.f32 %v2185_v42, %v331_v23  ;;  %v384_v39 = vmul.f32 %v2195_v2, %v331_v23 }
 0x358   :  { %v179_v41 = vadd.f32 %v147_v22, %v2738_v34 }
 0x359   :  { %1140 = vmatpush1.bf16.msra.mxu0 %v2051_v25  ;;  %1181 = vmatpush1.bf16.msra.mxu1 %v2053_v26  ;;  %v382_v25 = vmul.f32 %v2708_v40, %v331_v23  ;;  %v296_v26 = vadd.f32 %v264_v18, %v177_v20 }
 0x35a   :  { %1141 = vmatprep.subr.bf16.mxu0 %v2057_v27  ;;  %1182 = vmatprep.subr.bf16.mxu1 %v2059_v28  ;;  %v2736_v27 = vld [vmem:[#allocation17_spill] sm:$0xff]  ;;  %v298_v4 = vadd.f32 %v266_v61, %v179_v41 }
 0x35b   :  { %v383_v28 = vmul.f32 %v2736_v27, %v331_v23  ;;  %v414_v3 = vadd.f32 %v382_v25, %v295_v24 }
 0x35c   :  { %v417_v63 = vadd.f32 %v385_v37, %v298_v4  ;;  %v2388_v4 = vld [vmem:[#allocation4 + $0x20] ss:$16 sps:$4 sm:$0xff]   ;;  %v2391_v37 = vld [vmem:[#allocation4 + $0x28] ss:$16 sps:$4 sm:$0xff]  }
 0x35d   :  { %1142 = vmatpush1.bf16.msra.mxu0 %v2066_v30  ;;  %1183 = vmatpush1.bf16.msra.mxu1 %v2068_v31  ;;  %v415_v56 = vadd.f32 %v383_v28, %v296_v26 }
 0x35e   :  { %1143 = vmatprep.subr.bf16.mxu0 %v2072_v32  ;;  %1184 = vmatprep.subr.bf16.mxu1 %v2074_v33 }
 0x361   :  { %1144 = vmatpush1.bf16.msra.mxu0 %v2080_v35  ;;  %1185 = vmatpush1.bf16.msra.mxu1 %v2082_v36 }
 0x362   :  { %1244 = vmatprep.subr.bf16.mxu0 %v2727_v5  ;;  %1285 = vmatprep.subr.bf16.mxu1 %v2728_v6  ;;  %v416_v6 = vadd.f32 %v384_v39, %v297_v45  ;;  %v2433_v45 = vld [vmem:[#allocation4 + $0xac] ss:$16 sps:$4 sm:$0xff]   ;;  %v2436_v39 = vld [vmem:[#allocation4 + $0xa0] ss:$16 sps:$4 sm:$0xff]  }
 0x417   :  { %v1048_v59 = vpop.f32.mrb[12].mxu0  ;;  %v1089_v46 = vpop.f32.mrb[12].mxu1 }
 0x418   :  { %v1096_v38 = vadd.f32 %v1048_v59, %v414_v3  ;;  %v1050_v0 = vpop.f32.mrb[13].mxu0  ;;  %v1091_v60 = vpop.f32.mrb[13].mxu1  ;;  %v1098_v9 = vadd.f32 %v1089_v46, %v416_v6  ;;  %v2377_v59 = vld [vmem:[#allocation4 + $0x8] ss:$16 sps:$4 sm:$0xff]   ;;  %v2383_v46 = vld [vmem:[#allocation4 + $0x2c] ss:$16 sps:$4 sm:$0xff]  }
 0x419   :  { %v1097_v48 = vadd.f32 %v1050_v0, %v415_v56  ;;  %v1052_v53 = vpop.f32.mrb[14].mxu0  ;;  %v1093_v1 = vpop.f32.mrb[14].mxu1  ;;  %v1099_v5 = vadd.f32 %v1091_v60, %v417_v63  ;;  %v2374_v56 = vld [vmem:[#allocation4] ss:$16 sps:$4 sm:$0xff]   ;;  %v2403_v0 = vld [vmem:[#allocation4 + $0x48] ss:$16 sps:$4 sm:$0xff]  }
 0x41a   :  { %v1652_v55 = vmul.f32 -1.442695, %v1096_v38  ;;  %v1053_v47 = vpop.f32.mrb[15].mxu0  ;;  %v1094_v29 = vpop.f32.mrb[15].mxu1  ;;  %v2397_v38 = vld [vmem:[#allocation4 + $0x4c] ss:$16 sps:$4 sm:$0xff]  }
 0x41b   :  { %v1653_v52 = vmul.f32 -1.442695, %v1097_v48  ;;  %v1654_v7 = vmul.f32 -1.442695, %v1099_v5  ;;  %v2406_v60 = vld [vmem:[#allocation4 + $0x64] ss:$16 sps:$4 sm:$0xff]  }
 0x41c   :  { %1791 = vpow2.f32 %v1652_v55  ;;  %v2409_v48 = vld [vmem:[#allocation4 + $0x6c] ss:$16 sps:$4 sm:$0xff]   ;;  %v2412_v53 = vld [vmem:[#allocation4 + $0x60] ss:$16 sps:$4 sm:$0xff]   ;;  %v2415_v1 = vld [vmem:[#allocation4 + $0x68] ss:$16 sps:$4 sm:$0xff]  }
 0x41d   :  { %1793 = vpow2.f32 %v1653_v52  ;;  %v2418_v55 = vld [vmem:[#allocation4 + $0x84] ss:$16 sps:$4 sm:$0xff]   ;;  %v2421_v47 = vld [vmem:[#allocation4 + $0x8c] ss:$16 sps:$4 sm:$0xff]   ;;  %v2424_v29 = vld [vmem:[#allocation4 + $0x80] ss:$16 sps:$4 sm:$0xff]  }
 0x41e   :  { %1795 = vpow2.f32 %v1654_v7  ;;  %v2427_v52 = vld [vmem:[#allocation4 + $0x88] ss:$16 sps:$4 sm:$0xff]   ;;  %v2430_v63 = vld [vmem:[#allocation4 + $0xa4] ss:$16 sps:$4 sm:$0xff]   ;;  %v2445_v7 = vld [vmem:[#allocation4 + $0xcc] ss:$16 sps:$4 sm:$0xff]  }
 0x41f   :  { %1797 = vtanh.f32 %v1098_v9  ;;  %v2439_v5 = vld [vmem:[#allocation4 + $0xa8] ss:$16 sps:$4 sm:$0xff]   ;;  %v2442_v6 = vld [vmem:[#allocation4 + $0xc4] ss:$16 sps:$4 sm:$0xff]  }
 0x420   :  { %v2454_v9 = vld [vmem:[#allocation4 + $0x4] ss:$16 sps:$4 sm:$0xff]  }
 0x426   :  { %v1792_v11 = vpop.eup %1791 }
 0x427   :  { %v1794_v12 = vpop.eup %1793  ;;  %v1106_v14 = vadd.f32 1.0, %v1792_v11  ;;  %v2457_v11 = vld [vmem:[#allocation4 + $0xc] ss:$16 sps:$4 sm:$0xff]  }
 0x428   :  { %v1107_v16 = vadd.f32 1.0, %v1794_v12  ;;  %v1796_v18 = vpop.eup %1795 }
 0x429   :  { %1799 = vrcp.f32 %v1106_v14  ;;  %v1798_v20 = vpop.eup %1797  ;;  %v1116_v26 = vadd.f32 1.0, %v1796_v18  ;;  %v216_v14 = vpop.permute.xlu0 %215 }
 0x42a   :  { %1801 = vrcp.f32 %v1107_v16  ;;  %v267_v16 = vmul.f32 %v2731_v13, %v216_v14 }
 0x42b   :  { %1803 = vrcp.f32 %v1116_v26 }
 0x433   :  { %v1800_v22 = vpop.eup %1799 }
 0x434   :  { %v1802_v24 = vpop.eup %1801  ;;  %v1120_v25 = vmul.f32 %v1800_v22, %v1798_v20  ;;  %v268_v20 = vmul.f32 %v2733_v17, %v216_v14 }
 0x435   :  { %v1119_v23 = vmul.f32 %v1802_v24, %v2317_v49  ;;  %v1804_v61 = vpop.eup %1803  ;;  %v2380_v49 = vld [vmem:[#allocation4 + $0x24] ss:$16 sps:$4 sm:$0xff]  }
 0x437   :  { %v2371_v28 = vadd.f32 %v1120_v25, %v1119_v23 }
 0x439   :  { %1805 = vtanh.f32 %v2371_v28 }
 0x443   :  { %v1806_v41 = vpop.eup %1805 }
 0x444   :  { %v1123_v43 = vmul.f32 %v1806_v41, %v1804_v61 }
 0x446   :  { %v1128_v3 = vpack.c.bf16 %v1123_v43, %v1123_v43  ;;  %v270_v43 = vmul.f32 %v2737_v62, %v216_v14 }
 0x448   :  { %1162 = vmatmul.mubr.bf16.vlgmr.msra.gmra.mrb[16].mxu0 %v1128_v3  ;;  %1203 = vmatmul.mubr.bf16.vlgmr.msra.gmra.mrb[16].mxu1 %v1128_v3 }
 0x449   :  { %1245 = vmatpush1.bf16.msra.mxu0 %v2374_v56  ;;  %1286 = vmatpush1.bf16.msra.mxu1 %v2377_v59 }
 0x44a   :  { %1246 = vmatprep.subr.bf16.mxu0 %v2380_v49  ;;  %1287 = vmatprep.subr.bf16.mxu1 %v2383_v46 }
 0x44b   :  { %1276 = vmatprep.mubr.bf16.mxu0 %v2701_v44  ;;  %1317 = vmatprep.mubr.bf16.mxu1 %v2701_v44 }
 0x44d   :  { %1247 = vmatpush1.bf16.msra.mxu0 %v2388_v4  ;;  %1288 = vmatpush1.bf16.msra.mxu1 %v2391_v37 }
 0x44e   :  { %1248 = vmatprep.subr.bf16.mxu0 %v2394_v50  ;;  %1289 = vmatprep.subr.bf16.mxu1 %v2397_v38 }
 0x451   :  { %1249 = vmatpush1.bf16.msra.mxu0 %v2400_v58  ;;  %1290 = vmatpush1.bf16.msra.mxu1 %v2403_v0 }
 0x452   :  { %1250 = vmatprep.subr.bf16.mxu0 %v2406_v60  ;;  %1291 = vmatprep.subr.bf16.mxu1 %v2409_v48 }
 0x455   :  { %1251 = vmatpush1.bf16.msra.mxu0 %v2412_v53  ;;  %1292 = vmatpush1.bf16.msra.mxu1 %v2415_v1 }
 0x456   :  { %1252 = vmatprep.subr.bf16.mxu0 %v2418_v55  ;;  %1293 = vmatprep.subr.bf16.mxu1 %v2421_v47 }
 0x459   :  { %1253 = vmatpush1.bf16.msra.mxu0 %v2424_v29  ;;  %1294 = vmatpush1.bf16.msra.mxu1 %v2427_v52 }
 0x45a   :  { %1254 = vmatprep.subr.bf16.mxu0 %v2430_v63  ;;  %1295 = vmatprep.subr.bf16.mxu1 %v2433_v45 }
 0x45d   :  { %1255 = vmatpush1.bf16.msra.mxu0 %v2436_v39  ;;  %1296 = vmatpush1.bf16.msra.mxu1 %v2439_v5 }
 0x45e   :  { %1256 = vmatprep.subr.bf16.mxu0 %v2442_v6  ;;  %1297 = vmatprep.subr.bf16.mxu1 %v2445_v7 }
 0x461   :  { %1257 = vmatpush1.bf16.msra.mxu0 %v2066_v30  ;;  %1298 = vmatpush1.bf16.msra.mxu1 %v2068_v31  ;;  %v67_v30 = vld [vmem:[%s2635_s0 + $0x28] sm:$0xff]  ;;  %v68_v31 = vld [vmem:[%s2635_s0 + $0x30] sm:$0xff] }
 0x462   :  { %1258 = vmatprep.subr.bf16.mxu0 %v2072_v32  ;;  %1299 = vmatprep.subr.bf16.mxu1 %v2074_v33  ;;  %v2739_v32 = vmov 2   ;;  %v2740_v33 = vmov 1  }
 0x463   :  { %219 = vperm.xlu1 %1689, %v67_v30   ;;  %98 = vperm.xlu0 %1688, %v67_v30  }
 0x465   :  { %1259 = vmatpush1.bf16.msra.mxu0 %v2080_v35  ;;  %1300 = vmatpush1.bf16.msra.mxu1 %v2082_v36  ;;  %v94_v35 = vpop.permute.xlu1 %93 }
 0x466   :  { %1359 = vmatprep.subr.bf16.mxu0 %v2454_v9  ;;  %1400 = vmatprep.subr.bf16.mxu1 %v2457_v11  ;;  %v148_v36 = vmul.f32 %v2729_v8, %v94_v35  ;;  %v149_v12 = vmul.f32 %v2730_v10, %v94_v35  ;;  %v151_v25 = vmul.f32 %v2735_v21, %v94_v35 }
 0x467   :  { %1690 = vset.pattern.permute.xlu1 %v2739_v32  ;;  %103 = vperm.xlu0 %1688, %v68_v31  }
 0x468   :  { %338 = vperm.xlu1 %1690, %v67_v30   ;;  %v180_v18 = vadd.f32 %v148_v36, %v2732_v15  ;;  %v181_v24 = vadd.f32 %v149_v12, %v2734_v19  ;;  %v183_v3 = vadd.f32 %v151_v25, %v2738_v34  ;;  %v150_v30 = vmul.f32 %v2712_v54, %v94_v35 }
 0x469   :  { %v335_v22 = vpop.permute.xlu1 %334 }
 0x46a   :  { %v299_v26 = vadd.f32 %v267_v16, %v180_v18  ;;  %v386_v23 = vmul.f32 %v2708_v40, %v335_v22  ;;  %v300_v61 = vadd.f32 %v268_v20, %v181_v24  ;;  %v387_v41 = vmul.f32 %v2736_v27, %v335_v22 }
 0x46b   :  { %1692 = vset.pattern.permute.xlu0 %v2739_v32  ;;  %v302_v16 = vadd.f32 %v270_v43, %v183_v3  ;;  %v389_v18 = vmul.f32 %v2185_v42, %v335_v22  ;;  %v269_v27 = vmul.f32 %v2188_v57, %v216_v14  ;;  %v182_v25 = vadd.f32 %v150_v30, %v2190_v51 }
 0x46c   :  { %1691 = vset.pattern.permute.xlu1 %v2740_v33  ;;  %342 = vperm.xlu0 %1692, %v68_v31   ;;  %v419_v17 = vadd.f32 %v387_v41, %v300_v61  ;;  %v388_v41 = vmul.f32 %v2195_v2, %v335_v22 }
 0x46d   :  { %223 = vperm.xlu1 %1691, %v68_v31   ;;  %v418_v31 = vadd.f32 %v386_v23, %v299_v26  ;;  %v421_v23 = vadd.f32 %v389_v18, %v302_v16  ;;  %v301_v61 = vadd.f32 %v269_v27, %v182_v25  ;;  %v2519_v25 = vld [vmem:[#allocation4 + $0xc8] ss:$16 sps:$4 sm:$0xff]  }
 0x46f   :  { %v420_v43 = vadd.f32 %v388_v41, %v301_v61  ;;  %v2531_v61 = vld [vmem:[#allocation4 + $0xe8] ss:$16 sps:$4 sm:$0xff]  }
 0x470   :  { %v69_v41 = vld [vmem:[%s2635_s0 + $0x38] sm:$0xff] }
 0x471   :  { %1693 = vset.pattern.permute.xlu1 %v2701_v44  ;;  %346 = vperm.xlu0 %1692, %v69_v41  }
 0x472   :  { %108 = vperm.xlu1 %1693, %v69_v41  }
 0x476   :  { %1694 = vset.pattern.permute.xlu1 %v2740_v33 }
 0x477   :  { %227 = vperm.xlu1 %1694, %v69_v41  }
 0x51b   :  { %v1163_v32 = vpop.f32.mrb[16].mxu0  ;;  %v1204_v36 = vpop.f32.mrb[16].mxu1 }
 0x51c   :  { %v1211_v15 = vadd.f32 %v1163_v32, %v418_v31  ;;  %v1165_v12 = vpop.f32.mrb[17].mxu0  ;;  %v1206_v19 = vpop.f32.mrb[17].mxu1  ;;  %v1213_v31 = vadd.f32 %v1204_v36, %v420_v43 }
 0x51d   :  { %v1212_v21 = vadd.f32 %v1165_v12, %v419_v17  ;;  %v1167_v20 = vpop.f32.mrb[18].mxu0  ;;  %v1208_v24 = vpop.f32.mrb[18].mxu1  ;;  %v1214_v17 = vadd.f32 %v1206_v19, %v421_v23  ;;  %v2528_v23 = vld [vmem:[#allocation4 + $0xe0] ss:$16 sps:$4 sm:$0xff]  }
 0x51e   :  { %v1655_v62 = vmul.f32 -1.442695, %v1211_v15  ;;  %v1168_v34 = vpop.f32.mrb[19].mxu0  ;;  %v1209_v35 = vpop.f32.mrb[19].mxu1 }
 0x51f   :  { %v1656_v26 = vmul.f32 -1.442695, %v1212_v21  ;;  %v1657_v3 = vmul.f32 -1.442695, %v1214_v17  ;;  %v2522_v35 = vld [vmem:[#allocation4 + $0xe4] ss:$16 sps:$4 sm:$0xff]   ;;  %v99_v17 = vpop.permute.xlu0 %98 }
 0x520   :  { %1807 = vpow2.f32 %v1655_v62  ;;  %v152_v43 = vmul.f32 %v2729_v8, %v99_v17 }
 0x521   :  { %1809 = vpow2.f32 %v1656_v26  ;;  %v2525_v26 = vld [vmem:[#allocation4 + $0xec] ss:$16 sps:$4 sm:$0xff]  }
 0x522   :  { %1811 = vpow2.f32 %v1657_v3  ;;  %v220_v3 = vpop.permute.xlu1 %219 }
 0x523   :  { %1813 = vtanh.f32 %v1213_v31  ;;  %v153_v31 = vmul.f32 %v2730_v10, %v99_v17 }
 0x52a   :  { %v1808_v32 = vpop.eup %1807 }
 0x52b   :  { %v1810_v12 = vpop.eup %1809  ;;  %v1221_v20 = vadd.f32 1.0, %v1808_v32  ;;  %v271_v32 = vmul.f32 %v2731_v13, %v220_v3  ;;  %v154_v13 = vmul.f32 %v2712_v54, %v99_v17 }
 0x52c   :  { %v1222_v15 = vadd.f32 1.0, %v1810_v12  ;;  %v1812_v34 = vpop.eup %1811 }
 0x52d   :  { %1815 = vrcp.f32 %v1221_v20  ;;  %v1814_v21 = vpop.eup %1813  ;;  %v1231_v27 = vadd.f32 1.0, %v1812_v34 }
 0x52e   :  { %1817 = vrcp.f32 %v1222_v15  ;;  %v2743_v15 = vld [vmem:[#allocation14_spill] sm:$0xff] }
 0x52f   :  { %1819 = vrcp.f32 %v1231_v27  ;;  %v185_v34 = vadd.f32 %v153_v31, %v2743_v15 }
 0x537   :  { %v1816_v62 = vpop.eup %1815 }
 0x538   :  { %v1818_v14 = vpop.eup %1817  ;;  %v1235_v30 = vmul.f32 %v1816_v62, %v1814_v21  ;;  %v2744_v21 = vld [vmem:[#allocation15_spill] sm:$0xff] }
 0x539   :  { %v1234_v22 = vmul.f32 %v1818_v14, %v2371_v28  ;;  %v1820_v36 = vpop.eup %1819  ;;  %v2516_v28 = vld [vmem:[#allocation4 + $0xc0] ss:$16 sps:$4 sm:$0xff]   ;;  %v155_v62 = vmul.f32 %v2744_v21, %v99_v17  ;;  %v339_v14 = vpop.permute.xlu1 %338 }
 0x53a   :  { %v390_v33 = vmul.f32 %v2708_v40, %v339_v14 }
 0x53b   :  { %v2487_v19 = vadd.f32 %v1235_v30, %v1234_v22  ;;  %v2745_v22 = vld [vmem:[#allocation17_spill] sm:$0xff] }
 0x53d   :  { %1821 = vtanh.f32 %v2487_v19 }
 0x547   :  { %v1822_v16 = vpop.eup %1821 }
 0x548   :  { %v1238_v18 = vmul.f32 %v1822_v16, %v1820_v36  ;;  %v391_v36 = vmul.f32 %v2745_v22, %v339_v14  ;;  %v2746_v16 = vld [vmem:[#allocation18_spill] sm:$0xff]  ;;  %v273_v22 = vmul.f32 %v2188_v57, %v220_v3 }
 0x54a   :  { %v1243_v24 = vpack.c.bf16 %v1238_v18, %v1238_v18  ;;  %v274_v18 = vmul.f32 %v2746_v16, %v220_v3 }
 0x54c   :  { %1277 = vmatmul.mubr.bf16.vlgmr.msra.gmra.mrb[20].mxu0 %v1243_v24  ;;  %1318 = vmatmul.mubr.bf16.vlgmr.msra.gmra.mrb[20].mxu1 %v1243_v24  ;;  %v2747_v24 = vld [vmem:[#allocation19_spill] sm:$0xff] }
 0x54d   :  { %1360 = vmatpush1.bf16.msra.mxu0 %v2374_v56  ;;  %1401 = vmatpush1.bf16.msra.mxu1 %v2377_v59  ;;  %v187_v41 = vadd.f32 %v155_v62, %v2747_v24  ;;  %v186_v62 = vadd.f32 %v154_v13, %v2190_v51 }
 0x54e   :  { %1361 = vmatprep.subr.bf16.mxu0 %v2380_v49  ;;  %1402 = vmatprep.subr.bf16.mxu1 %v2383_v46 }
 0x54f   :  { %1391 = vmatprep.mubr.bf16.mxu0 %v2701_v44  ;;  %1432 = vmatprep.mubr.bf16.mxu1 %v2701_v44 }
 0x551   :  { %1362 = vmatpush1.bf16.msra.mxu0 %v2388_v4  ;;  %1403 = vmatpush1.bf16.msra.mxu1 %v2391_v37 }
 0x552   :  { %1363 = vmatprep.subr.bf16.mxu0 %v2394_v50  ;;  %1404 = vmatprep.subr.bf16.mxu1 %v2397_v38 }
 0x555   :  { %1364 = vmatpush1.bf16.msra.mxu0 %v2400_v58  ;;  %1405 = vmatpush1.bf16.msra.mxu1 %v2403_v0 }
 0x556   :  { %1365 = vmatprep.subr.bf16.mxu0 %v2406_v60  ;;  %1406 = vmatprep.subr.bf16.mxu1 %v2409_v48 }
 0x559   :  { %1366 = vmatpush1.bf16.msra.mxu0 %v2412_v53  ;;  %1407 = vmatpush1.bf16.msra.mxu1 %v2415_v1 }
 0x55a   :  { %1367 = vmatprep.subr.bf16.mxu0 %v2418_v55  ;;  %1408 = vmatprep.subr.bf16.mxu1 %v2421_v47 }
 0x55d   :  { %1368 = vmatpush1.bf16.msra.mxu0 %v2424_v29  ;;  %1409 = vmatpush1.bf16.msra.mxu1 %v2427_v52 }
 0x55e   :  { %1369 = vmatprep.subr.bf16.mxu0 %v2430_v63  ;;  %1410 = vmatprep.subr.bf16.mxu1 %v2433_v45 }
 0x561   :  { %1370 = vmatpush1.bf16.msra.mxu0 %v2436_v39  ;;  %1411 = vmatpush1.bf16.msra.mxu1 %v2439_v5 }
 0x562   :  { %1371 = vmatprep.subr.bf16.mxu0 %v2442_v6  ;;  %1412 = vmatprep.subr.bf16.mxu1 %v2445_v7 }
 0x565   :  { %1372 = vmatpush1.bf16.msra.mxu0 %v2516_v28  ;;  %1413 = vmatpush1.bf16.msra.mxu1 %v2519_v25 }
 0x566   :  { %1373 = vmatprep.subr.bf16.mxu0 %v2522_v35  ;;  %1414 = vmatprep.subr.bf16.mxu1 %v2525_v26 }
 0x569   :  { %1374 = vmatpush1.bf16.msra.mxu0 %v2528_v23  ;;  %1415 = vmatpush1.bf16.msra.mxu1 %v2531_v61 }
 0x56a   :  { %1474 = vmatprep.subr.bf16.mxu0 %v2454_v9  ;;  %1515 = vmatprep.subr.bf16.mxu1 %v2457_v11  ;;  %v2741_v9 = vld [vmem:[#allocation12_spill] sm:$0xff]  ;;  %v2742_v11 = vld [vmem:[#allocation13_spill] sm:$0xff] }
 0x56b   :  { %v184_v12 = vadd.f32 %v152_v43, %v2741_v9  ;;  %v272_v20 = vmul.f32 %v2742_v11, %v220_v3 }
 0x56d   :  { %v303_v30 = vadd.f32 %v271_v32, %v184_v12  ;;  %v304_v27 = vadd.f32 %v272_v20, %v185_v34  ;;  %v306_v32 = vadd.f32 %v274_v18, %v187_v41  ;;  %v393_v12 = vmul.f32 %v2185_v42, %v339_v14 }
 0x56f   :  { %v422_v43 = vadd.f32 %v390_v33, %v303_v30  ;;  %v423_v10 = vadd.f32 %v391_v36, %v304_v27  ;;  %v425_v33 = vadd.f32 %v393_v12, %v306_v32  ;;  %v392_v27 = vmul.f32 %v2195_v2, %v339_v14 }
 0x61f   :  { %v1278_v9 = vpop.f32.mrb[20].mxu0  ;;  %v1319_v11 = vpop.f32.mrb[20].mxu1 }
 0x620   :  { %v1326_v31 = vadd.f32 %v1278_v9, %v422_v43  ;;  %v1280_v15 = vpop.f32.mrb[21].mxu0  ;;  %v1321_v21 = vpop.f32.mrb[21].mxu1  ;;  %v305_v9 = vadd.f32 %v273_v22, %v186_v62 }
 0x621   :  { %v1327_v8 = vadd.f32 %v1280_v15, %v423_v10  ;;  %v1282_v20 = vpop.f32.mrb[22].mxu0  ;;  %v1323_v34 = vpop.f32.mrb[22].mxu1  ;;  %v1329_v10 = vadd.f32 %v1321_v21, %v425_v33 }
 0x622   :  { %v1658_v16 = vmul.f32 -1.442695, %v1326_v31  ;;  %v1283_v24 = vpop.f32.mrb[23].mxu0  ;;  %v1324_v17 = vpop.f32.mrb[23].mxu1  ;;  %v424_v15 = vadd.f32 %v392_v27, %v305_v9 }
 0x623   :  { %v1659_v30 = vmul.f32 -1.442695, %v1327_v8  ;;  %v1660_v36 = vmul.f32 -1.442695, %v1329_v10 }
 0x624   :  { %1823 = vpow2.f32 %v1658_v16  ;;  %v1328_v18 = vadd.f32 %v1319_v11, %v424_v15 }
 0x625   :  { %1825 = vpow2.f32 %v1659_v30 }
 0x626   :  { %1827 = vpow2.f32 %v1660_v36 }
 0x627   :  { %1829 = vtanh.f32 %v1328_v18 }
 0x62e   :  { %v1824_v41 = vpop.eup %1823 }
 0x62f   :  { %v1826_v43 = vpop.eup %1825  ;;  %v1336_v20 = vadd.f32 1.0, %v1824_v41 }
 0x630   :  { %v1337_v3 = vadd.f32 1.0, %v1826_v43  ;;  %v1828_v13 = vpop.eup %1827 }
 0x631   :  { %1831 = vrcp.f32 %v1336_v20  ;;  %v1830_v8 = vpop.eup %1829  ;;  %v1346_v22 = vadd.f32 1.0, %v1828_v13 }
 0x632   :  { %1833 = vrcp.f32 %v1337_v3 }
 0x633   :  { %1835 = vrcp.f32 %v1346_v22 }
 0x63b   :  { %v1832_v16 = vpop.eup %1831 }
 0x63c   :  { %v1834_v24 = vpop.eup %1833  ;;  %v1350_v31 = vmul.f32 %v1832_v16, %v1830_v8 }
 0x63d   :  { %v1349_v14 = vmul.f32 %v1834_v24, %v2487_v19  ;;  %v1836_v11 = vpop.eup %1835 }
 0x63f   :  { %v2557_v21 = vadd.f32 %v1350_v31, %v1349_v14 }
 0x641   :  { %1837 = vtanh.f32 %v2557_v21 }
 0x64b   :  { %v1838_v32 = vpop.eup %1837 }
 0x64c   :  { %v1353_v12 = vmul.f32 %v1838_v32, %v1836_v11 }
 0x64e   :  { %v1358_v34 = vpack.c.bf16 %v1353_v12, %v1353_v12 }
 0x650   :  { %1392 = vmatmul.mubr.bf16.vlgmr.msra.gmra.mrb[24].mxu0 %v1358_v34  ;;  %1433 = vmatmul.mubr.bf16.vlgmr.msra.gmra.mrb[24].mxu1 %v1358_v34 }
 0x651   :  { %1475 = vmatpush1.bf16.msra.mxu0 %v2374_v56  ;;  %1516 = vmatpush1.bf16.msra.mxu1 %v2377_v59  ;;  %v2748_v56 = vld [vmem:[#allocation9_spill] sm:$0xff] }
 0x652   :  { %1476 = vmatprep.subr.bf16.mxu0 %v2380_v49  ;;  %1517 = vmatprep.subr.bf16.mxu1 %v2383_v46  ;;  %v2749_v49 = vld [vmem:[#allocation10_spill] sm:$0xff] }
 0x653   :  { %1506 = vmatprep.mubr.bf16.mxu0 %v2701_v44  ;;  %1547 = vmatprep.mubr.bf16.mxu1 %v2701_v44  ;;  %v104_v44 = vpop.permute.xlu0 %103 }
 0x654   :  { %v156_v59 = vmul.f32 %v2748_v56, %v104_v44  ;;  %v157_v46 = vmul.f32 %v2749_v49, %v104_v44 }
 0x655   :  { %1477 = vmatpush1.bf16.msra.mxu0 %v2388_v4  ;;  %1518 = vmatpush1.bf16.msra.mxu1 %v2391_v37  ;;  %v224_v4 = vpop.permute.xlu1 %223  ;;  %v2750_v37 = vld [vmem:[#allocation11_spill] sm:$0xff] }
 0x656   :  { %1478 = vmatprep.subr.bf16.mxu0 %v2394_v50  ;;  %1519 = vmatprep.subr.bf16.mxu1 %v2397_v38  ;;  %v275_v50 = vmul.f32 %v2750_v37, %v224_v4  ;;  %v2751_v38 = vld [vmem:[#allocation12_spill] sm:$0xff]  ;;  %v277_v15 = vmul.f32 %v2188_v57, %v224_v4 }
 0x659   :  { %1479 = vmatpush1.bf16.msra.mxu0 %v2400_v58  ;;  %1520 = vmatpush1.bf16.msra.mxu1 %v2403_v0  ;;  %v188_v58 = vadd.f32 %v156_v59, %v2751_v38  ;;  %v2752_v0 = vld [vmem:[#allocation13_spill] sm:$0xff] }
 0x65a   :  { %1480 = vmatprep.subr.bf16.mxu0 %v2406_v60  ;;  %1521 = vmatprep.subr.bf16.mxu1 %v2409_v48  ;;  %v276_v60 = vmul.f32 %v2752_v0, %v224_v4  ;;  %v343_v48 = vpop.permute.xlu0 %342 }
 0x65b   :  { %v397_v9 = vmul.f32 %v2185_v42, %v343_v48  ;;  %v396_v8 = vmul.f32 %v2195_v2, %v343_v48 }
 0x65d   :  { %1481 = vmatpush1.bf16.msra.mxu0 %v2412_v53  ;;  %1522 = vmatpush1.bf16.msra.mxu1 %v2415_v1  ;;  %v2753_v53 = vld [vmem:[#allocation14_spill] sm:$0xff] }
 0x65e   :  { %1482 = vmatprep.subr.bf16.mxu0 %v2418_v55  ;;  %1523 = vmatprep.subr.bf16.mxu1 %v2421_v47  ;;  %v189_v1 = vadd.f32 %v157_v46, %v2753_v53  ;;  %v2754_v55 = vld [vmem:[#allocation15_spill] sm:$0xff] }
 0x65f   :  { %v159_v47 = vmul.f32 %v2754_v55, %v104_v44 }
 0x661   :  { %1483 = vmatpush1.bf16.msra.mxu0 %v2424_v29  ;;  %1524 = vmatpush1.bf16.msra.mxu1 %v2427_v52  ;;  %v307_v29 = vadd.f32 %v275_v50, %v188_v58  ;;  %v394_v52 = vmul.f32 %v2708_v40, %v343_v48 }
 0x662   :  { %1484 = vmatprep.subr.bf16.mxu0 %v2430_v63  ;;  %1525 = vmatprep.subr.bf16.mxu1 %v2433_v45  ;;  %v308_v63 = vadd.f32 %v276_v60, %v189_v1  ;;  %v2755_v45 = vld [vmem:[#allocation17_spill] sm:$0xff] }
 0x665   :  { %1485 = vmatpush1.bf16.msra.mxu0 %v2436_v39  ;;  %1526 = vmatpush1.bf16.msra.mxu1 %v2439_v5  ;;  %v395_v39 = vmul.f32 %v2755_v45, %v343_v48  ;;  %v2756_v5 = vld [vmem:[#allocation18_spill] sm:$0xff] }
 0x666   :  { %1486 = vmatprep.subr.bf16.mxu0 %v2442_v6  ;;  %1527 = vmatprep.subr.bf16.mxu1 %v2445_v7  ;;  %v278_v6 = vmul.f32 %v2756_v5, %v224_v4  ;;  %v2757_v7 = vld [vmem:[#allocation19_spill] sm:$0xff] }
 0x667   :  { %v191_v19 = vadd.f32 %v159_v47, %v2757_v7 }
 0x669   :  { %1487 = vmatpush1.bf16.msra.mxu0 %v2516_v28  ;;  %1528 = vmatpush1.bf16.msra.mxu1 %v2519_v25  ;;  %v158_v28 = vmul.f32 %v2712_v54, %v104_v44  ;;  %v426_v25 = vadd.f32 %v394_v52, %v307_v29  ;;  %v310_v33 = vadd.f32 %v278_v6, %v191_v19  ;;  %v109_v52 = vpop.permute.xlu1 %108 }
 0x66a   :  { %1488 = vmatprep.subr.bf16.mxu0 %v2522_v35  ;;  %1529 = vmatprep.subr.bf16.mxu1 %v2525_v26 }
 0x66b   :  { %v190_v18 = vadd.f32 %v158_v28, %v2190_v51  ;;  %v429_v3 = vadd.f32 %v397_v9, %v310_v33 }
 0x66d   :  { %1489 = vmatpush1.bf16.msra.mxu0 %v2528_v23  ;;  %1530 = vmatpush1.bf16.msra.mxu1 %v2531_v61  ;;  %v427_v23 = vadd.f32 %v395_v39, %v308_v63  ;;  %v309_v13 = vadd.f32 %v277_v15, %v190_v18  ;;  %v160_v63 = vmul.f32 %v2748_v56, %v109_v52  ;;  %v228_v6 = vpop.permute.xlu1 %227 }
 0x66e   :  { %v161_v39 = vmul.f32 %v2749_v49, %v109_v52  ;;  %v279_v19 = vmul.f32 %v2750_v37, %v228_v6  ;;  %v280_v28 = vmul.f32 %v2752_v0, %v228_v6  ;;  %v282_v49 = vmul.f32 %v2756_v5, %v228_v6 }
 0x66f   :  { %v428_v24 = vadd.f32 %v396_v8, %v309_v13  ;;  %v162_v37 = vmul.f32 %v2712_v54, %v109_v52 }
 0x723   :  { %v1393_v35 = vpop.f32.mrb[24].mxu0  ;;  %v1434_v26 = vpop.f32.mrb[24].mxu1 }
 0x724   :  { %v1441_v61 = vadd.f32 %v1393_v35, %v426_v25  ;;  %v1395_v62 = vpop.f32.mrb[25].mxu0  ;;  %v1436_v17 = vpop.f32.mrb[25].mxu1  ;;  %v1443_v22 = vadd.f32 %v1434_v26, %v428_v24  ;;  %v193_v35 = vadd.f32 %v161_v39, %v2753_v53  ;;  %v163_v26 = vmul.f32 %v2754_v55, %v109_v52 }
 0x725   :  { %v1442_v30 = vadd.f32 %v1395_v62, %v427_v23  ;;  %v1397_v27 = vpop.f32.mrb[26].mxu0  ;;  %v1438_v10 = vpop.f32.mrb[26].mxu1  ;;  %v1444_v16 = vadd.f32 %v1436_v17, %v429_v3 }
 0x726   :  { %v1661_v36 = vmul.f32 -1.442695, %v1441_v61  ;;  %v1398_v41 = vpop.f32.mrb[27].mxu0  ;;  %v1439_v43 = vpop.f32.mrb[27].mxu1  ;;  %v312_v56 = vadd.f32 %v280_v28, %v193_v35  ;;  %v195_v17 = vadd.f32 %v163_v26, %v2757_v7  ;;  %v194_v7 = vadd.f32 %v162_v37, %v2190_v51 }
 0x727   :  { %v1662_v20 = vmul.f32 -1.442695, %v1442_v30  ;;  %v1663_v31 = vmul.f32 -1.442695, %v1444_v16  ;;  %v347_v25 = vpop.permute.xlu0 %346 }
 0x728   :  { %1839 = vpow2.f32 %v1661_v36  ;;  %v398_v23 = vmul.f32 %v2708_v40, %v347_v25  ;;  %v399_v62 = vmul.f32 %v2755_v45, %v347_v25  ;;  %v401_v55 = vmul.f32 %v2185_v42, %v347_v25 }
 0x729   :  { %1841 = vpow2.f32 %v1662_v20  ;;  %v314_v10 = vadd.f32 %v282_v49, %v195_v17  ;;  %v281_v36 = vmul.f32 %v2188_v57, %v228_v6  ;;  %v400_v20 = vmul.f32 %v2195_v2, %v347_v25 }
 0x72a   :  { %1843 = vpow2.f32 %v1663_v31  ;;  %v431_v33 = vadd.f32 %v399_v62, %v312_v56 }
 0x72b   :  { %1845 = vtanh.f32 %v1443_v22  ;;  %v433_v43 = vadd.f32 %v401_v55, %v314_v10  ;;  %v313_v3 = vadd.f32 %v281_v36, %v194_v7 }
 0x72d   :  { %v432_v42 = vadd.f32 %v400_v20, %v313_v3 }
 0x732   :  { %v1840_v14 = vpop.eup %1839 }
 0x733   :  { %v1842_v11 = vpop.eup %1841  ;;  %v1451_v32 = vadd.f32 1.0, %v1840_v14 }
 0x734   :  { %v1452_v12 = vadd.f32 1.0, %v1842_v11  ;;  %v1844_v34 = vpop.eup %1843 }
 0x735   :  { %1847 = vrcp.f32 %v1451_v32  ;;  %v1846_v44 = vpop.eup %1845  ;;  %v1461_v50 = vadd.f32 1.0, %v1844_v34 }
 0x736   :  { %1849 = vrcp.f32 %v1452_v12 }
 0x737   :  { %1851 = vrcp.f32 %v1461_v50 }
 0x73f   :  { %v1848_v59 = vpop.eup %1847 }
 0x740   :  { %v1850_v46 = vpop.eup %1849  ;;  %v1465_v4 = vmul.f32 %v1848_v59, %v1846_v44 }
 0x741   :  { %v1464_v58 = vmul.f32 %v1850_v46, %v2557_v21  ;;  %v1852_v48 = vpop.eup %1851  ;;  %v192_v21 = vadd.f32 %v160_v63, %v2751_v38 }
 0x743   :  { %v2609_v60 = vadd.f32 %v1465_v4, %v1464_v58  ;;  %v311_v61 = vadd.f32 %v279_v19, %v192_v21  ;;  %v1667_v4 = vld [vmem:[%s2639_s4] ss:$0 sm:$0xff] }
 0x745   :  { %1853 = vtanh.f32 %v2609_v60  ;;  %v430_v38 = vadd.f32 %v398_v23, %v311_v61 }
 0x74f   :  { %v1854_v1 = vpop.eup %1853 }
 0x750   :  { %v1468_v47 = vmul.f32 %v1854_v1, %v1852_v48  ;;  %v1668_v48 = vld [vmem:[#allocation3] ss:$0 sm:$0xff] }
 0x752   :  { %v1473_v29 = vpack.c.bf16 %v1468_v47, %v1468_v47 }
 0x754   :  { %1507 = vmatmul.mubr.bf16.vlgmr.msra.gmra.mrb[28].mxu0 %v1473_v29  ;;  %1548 = vmatmul.mubr.bf16.vlgmr.msra.gmra.mrb[28].mxu1 %v1473_v29 }
 0x827   :  { %v1508_v30 = vpop.f32.mrb[28].mxu0  ;;  %v1549_v0 = vpop.f32.mrb[28].mxu1 }
 0x828   :  { %v1556_v9 = vadd.f32 %v1508_v30, %v430_v38  ;;  %v1510_v53 = vpop.f32.mrb[29].mxu0  ;;  %v1551_v27 = vpop.f32.mrb[29].mxu1  ;;  %v1558_v16 = vadd.f32 %v1549_v0, %v432_v42 }
 0x829   :  { %v1557_v40 = vadd.f32 %v1510_v53, %v431_v33  ;;  %v1512_v15 = vpop.f32.mrb[30].mxu0  ;;  %v1553_v45 = vpop.f32.mrb[30].mxu1  ;;  %v1559_v13 = vadd.f32 %v1551_v27, %v433_v43 }
 0x82a   :  { %v1664_v5 = vmul.f32 -1.442695, %v1556_v9  ;;  %v1513_v18 = vpop.f32.mrb[31].mxu0  ;;  %v1554_v54 = vpop.f32.mrb[31].mxu1 }
 0x82b   :  { %v1665_v41 = vmul.f32 -1.442695, %v1557_v40  ;;  %v1666_v8 = vmul.f32 -1.442695, %v1559_v13 }
 0x82c   :  { %1855 = vpow2.f32 %v1664_v5 }
 0x82d   :  { %1857 = vpow2.f32 %v1665_v41 }
 0x82e   :  { %1859 = vpow2.f32 %v1666_v8 }
 0x82f   :  { %1861 = vtanh.f32 %v1558_v16 }
 0x836   :  { %v1856_v24 = vpop.eup %1855 }
 0x837   :  { %v1858_v31 = vpop.eup %1857  ;;  %v1566_v22 = vadd.f32 1.0, %v1856_v24 }
 0x838   :  { %v1567_v57 = vadd.f32 1.0, %v1858_v31  ;;  %v1860_v51 = vpop.eup %1859 }
 0x839   :  { %1863 = vrcp.f32 %v1566_v22  ;;  %v1862_v14 = vpop.eup %1861  ;;  %v1576_v34 = vadd.f32 1.0, %v1860_v51 }
 0x83a   :  { %1865 = vrcp.f32 %v1567_v57 }
 0x83b   :  { %1867 = vrcp.f32 %v1576_v34 }
 0x843   :  { %v1864_v11 = vpop.eup %1863 }
 0x844   :  { %v1866_v32 = vpop.eup %1865  ;;  %v1580_v12 = vmul.f32 %v1864_v11, %v1862_v14 }
 0x845   :  { %v1579_v2 = vmul.f32 %v1866_v32, %v2609_v60  ;;  %v1868_v59 = vpop.eup %1867 }
 0x847   :  { %v1581_v44 = vadd.f32 %v1580_v12, %v1579_v2 }
 0x849   :  { %1869 = vtanh.f32 %v1581_v44 }
 0x853   :  { %v1870_v46 = vpop.eup %1869 }
 0x854   :  { %v1583_v50 = vmul.f32 %v1870_v46, %v1868_v59 }
 0x856   :  { %v1591_v58 = vmul.f32 %v1667_v4, %v1583_v50 }
 0x858   :  { %1592 = vadd.xlane.f32.xlu1 %v1591_v58 }
 0x8e5   :  { %v1593_v1 = vpop.xlane.xlu1 %1592 }
 0x8e6   :  { %v1601_v47 = vadd.f32 %v1668_v48, %v1593_v1 }
 0x8e8   :  { %1603 = vst.msk [vmem:[%s2641_s6] sm:$0xff] %vm1602_vm0, %v1601_v47 }
 0x8e9   :  { %1608 = vsyncpa [#allocation5], 1 }

</bundles_post_ra>
